<compile_context>
chip_gen: v6e
topology: v6e:2x2x1
jax: 0.10.0
libtpu: 0.0.40
codegen_flags: <defaults>
</compile_context>

<pallas_src>
import numpy as np
import jax
import jax.numpy as jnp
from jax.experimental import pallas as pl
from jax.experimental.pallas import tpu as pltpu

NUM_FREQ = 8
ENC_DIM = NUM_FREQ * 2 * 2  # 32


def _round_up(x, m):
    return (x + m - 1) // m * m


def _encoding_tables():
    """Constant tables for the fused positional encoding (feature-major).

    Encoding row j (of 32) is sin(freq[j%8] * x_c + phase_j) with
    phase_j = pi/2 on "cos" rows, c = j // 16 — matching
    torch.stack([sin, cos], dim=-2).view(..., -1).
    """
    freq = (2.0 ** np.arange(NUM_FREQ, dtype=np.float32)) * np.float32(np.pi)
    fa = np.zeros((ENC_DIM, 1), np.float32)   # coefficient on coordinate 0
    fb = np.zeros((ENC_DIM, 1), np.float32)   # coefficient on coordinate 1
    ph = np.zeros((ENC_DIM, 1), np.float32)   # +pi/2 on cos rows
    fa[0:8, 0] = freq
    fa[8:16, 0] = freq
    fb[16:24, 0] = freq
    fb[24:32, 0] = freq
    ph[8:16, 0] = np.float32(np.pi / 2)
    ph[24:32, 0] = np.float32(np.pi / 2)
    return jnp.asarray(fa), jnp.asarray(fb), jnp.asarray(ph)


def prepare_params(params):
    """One-time weight preparation (fusion, transposes, bf16 casts)."""
    wpos, bpos, z, w1, b1, w2, b2, w3, b3 = params
    # Fold pos_linear (+ z_vector) into the first to_distance layer:
    #   h1 = w1.T @ (wpos.T @ enc + (bpos + z).T) + b1.T
    #      = (w1.T @ wpos.T) @ enc + (w1.T @ (bpos + z).T + b1.T)
    w_fused = (w1.T @ wpos.T).astype(jnp.bfloat16)               # (256, 32)
    b_fused = (w1.T @ (bpos + z).T + b1.T).astype(jnp.float32)   # (256, 1)
    w2_t = w2.T.astype(jnp.bfloat16)                             # (128, 256)
    b2_t = b2.T.astype(jnp.float32)                              # (128, 1)
    w3_c = w3.astype(jnp.float32)                                # (128, 1)
    b3_c = b3.reshape(1, 1).astype(jnp.float32)                  # (1, 1)
    fa, fb, ph = _encoding_tables()
    return (fa, fb, ph, w_fused, b_fused, w2_t, b2_t, w3_c, b3_c)


def base_model_kernel(ptsT_ref, fa_ref, fb_ref, ph_ref,
                      wf_ref, bf_ref, w2_ref, b2_ref, w3_ref, b3_ref, out_ref):
    ptsT = ptsT_ref[...]                       # (2, TM)  points, rows on lanes
    x0 = ptsT[0:1, :]                          # (1, TM)
    x1 = ptsT[1:2, :]                          # (1, TM)

    # Fused positional encoding, feature-major, sin-only via phase offset.
    arg = fa_ref[...] * x0 + fb_ref[...] * x1 + ph_ref[...]      # (32, TM) f32
    enc = jnp.sin(arg)                                           # (32, TM) f32

    # Fused (pos_linear + z + to_distance[0]) layer: bf16 MXU, f32 accumulate.
    h = jnp.dot(wf_ref[...], enc.astype(jnp.bfloat16),
                preferred_element_type=jnp.float32) + bf_ref[...]  # (256, TM)
    h = jnp.maximum(h, 0.0)

    # to_distance[2]: Linear(256, 128) + ReLU, bf16 MXU, f32 accumulate.
    h = jnp.dot(w2_ref[...], h.astype(jnp.bfloat16),
                preferred_element_type=jnp.float32) + b2_ref[...]  # (128, TM)
    h = jnp.maximum(h, 0.0)

    # Final Linear(128, 1): VPU multiply + sublane (XLU) reduce, f32.
    out = jnp.sum(h * w3_ref[...], axis=0, keepdims=True) + b3_ref[...]  # (1, TM)
    out_ref[...] = out


def _choose_tiling(M, tile_m):
    tile_m = max(128, min(tile_m, _round_up(M, 128)))
    tile_m = _round_up(tile_m, 128)
    # Keep >= 2 grid steps when there is enough work, so the single "parallel"
    # axis can shard across v7x's two TensorCores (harmless on v5e/v6e).
    if _round_up(M, tile_m) // tile_m < 2 and M > 256:
        tile_m = _round_up(-(-M // 2), 128)
    M_pad = _round_up(M, tile_m)
    return tile_m, M_pad


def base_model_forward(points, prepped, *, tile_m=4096):
    """points: (B, N, 2) float32, prepped = prepare_params(params) -> (B, N)."""
    B, N, D = points.shape
    assert D == 2
    M = B * N

    tile_m, M_pad = _choose_tiling(M, tile_m)
    num_tiles = M_pad // tile_m

    pts = points.reshape(M, 2).astype(jnp.float32)
    if M_pad != M:
        # Padded tail rows flow through the MLP and are sliced off below.
        pts = jnp.pad(pts, ((0, M_pad - M), (0, 0)))
    pts_t = pts.T                                         # (2, M_pad)

    fa, fb, ph, w_fused, b_fused, w2_t, b2_t, w3_c, b3_c = prepped

    def full(arr):
        # Whole-array block with a constant index_map: stays resident in VMEM
        # across grid steps (no per-step re-DMA).
        return pl.BlockSpec(arr.shape, lambda i: (0, 0))

    weight_args = (fa, fb, ph, w_fused, b_fused, w2_t, b2_t, w3_c, b3_c)
    weight_bytes = int(sum(a.size * a.dtype.itemsize for a in weight_args))
    cost = pl.CostEstimate(
        flops=2 * M_pad * (256 * 32 + 128 * 256 + 128),
        transcendentals=32 * M_pad,
        bytes_accessed=12 * M_pad + weight_bytes,
    )

    out = pl.pallas_call(
        base_model_kernel,
        out_shape=jax.ShapeDtypeStruct((num_tiles, tile_m), jnp.float32),
        grid_spec=pltpu.PrefetchScalarGridSpec(
            num_scalar_prefetch=0,
            grid=(num_tiles,),
            in_specs=[
                pl.BlockSpec((2, tile_m), lambda i: (0, i)),   # points (transposed)
                full(fa), full(fb), full(ph),
                full(w_fused), full(b_fused),
                full(w2_t), full(b2_t),
                full(w3_c), full(b3_c),
            ],
            out_specs=pl.BlockSpec((1, tile_m), lambda i: (i, 0)),  # lane-dense row
        ),
        compiler_params=pltpu.CompilerParams(
            dimension_semantics=("parallel",),
            vmem_limit_bytes=64 * 1024 * 1024),
        cost_estimate=cost,
    )(pts_t, *weight_args)

    return out.reshape(M_pad)[:M].reshape(B, N)


def init_params(key):
    """Deterministic synthetic params with the same shapes as the nn.Module."""
    k = jax.random.split(key, 5)

    def linear(kk, fan_in, fan_out):
        bound = 1.0 / np.sqrt(fan_in)
        kw, kb = jax.random.split(kk)
        w = jax.random.uniform(kw, (fan_in, fan_out), jnp.float32, -bound, bound)
        b = jax.random.uniform(kb, (1, fan_out), jnp.float32, -bound, bound)
        return w, b

    wpos, bpos = linear(k[0], NUM_FREQ * 2 * 2, 256)        # pos_linear
    z = jax.random.uniform(k[1], (1, 256), jnp.float32)     # z_vector ~ rand(1,256)
    w1, b1 = linear(k[2], 256, 256)                         # to_distance[0]
    w2, b2 = linear(k[3], 256, 128)                         # to_distance[2]
    w3, b3 = linear(k[4], 128, 1)                           # to_distance[4]
    return (wpos, bpos, z, w1, b1, w2, b2, w3, b3)


def base_model_reference(points, params):
    """Pure-JAX f32 reference mirroring the PyTorch forward exactly."""
    wpos, bpos, z, w1, b1, w2, b2, w3, b3 = params
    freq = (2.0 ** jnp.arange(NUM_FREQ, dtype=jnp.float32)) * jnp.pi
    spectrum = points[..., None] * freq                     # (B, N, 2, 8)
    enc = jnp.stack([jnp.sin(spectrum), jnp.cos(spectrum)], axis=-2)  # (B,N,2,2,8)
    enc = enc.reshape(*points.shape[:-1], -1)               # (B, N, 32)

    mm = lambda a, b: jnp.dot(a, b, precision=jax.lax.Precision.HIGHEST)
    h = mm(enc, wpos) + bpos                                # pos_linear
    h = h + z                                               # + z_vector[:, None]
    h = jax.nn.relu(mm(h, w1) + b1)
    h = jax.nn.relu(mm(h, w2) + b2)
    out = mm(h, w3) + b3                                    # (B, N, 1)
    return out[:, :, 0]


if __name__ == "__main__":
    key = jax.random.PRNGKey(0)
    kp, kx1, kx2 = jax.random.split(key, 3)

    params = init_params(kp)
    prepped = prepare_params(params)   # one-time weight fusion / bf16 cast

    # bf16 MXU operands carry bf16-class error vs. the f32 HIGHEST reference,
    # hence the relaxed tolerance (per review guidance).
    RTOL = ATOL = 3e-2

    # Small case: M = 128 rows -> single tile.
    B, N = 2, 64
    points = jax.random.uniform(kx1, (B, N, 2), jnp.float32, -1.0, 1.0)
    sdfs = jnp.zeros((B, N), jnp.float32)                   # unused by forward
    # TODO(synk): loss() (F.l1_loss) is training-only and not part of the forward
    # hot path; not kernelized.

    pred_udf = base_model_forward(points, prepped)
    pred_udf = jax.block_until_ready(pred_udf)
    ref = base_model_reference(points, params)
    np.testing.assert_allclose(np.asarray(pred_udf), np.asarray(ref),
                               rtol=RTOL, atol=ATOL)

    # Non-divisible case: M = 300 rows with tile_m=128 -> 3 tiles + row padding.
    B2, N2 = 3, 100
    points2 = jax.random.uniform(kx2, (B2, N2, 2), jnp.float32, -1.0, 1.0)
    pred2 = jax.block_until_ready(
        base_model_forward(points2, prepped, tile_m=128))
    ref2 = base_model_reference(points2, params)
    np.testing.assert_allclose(np.asarray(pred2), np.asarray(ref2),
                               rtol=RTOL, atol=ATOL)

    print("KERNEL_OK")
</pallas_src>

<mosaic_0001>
module attributes {stable_mosaic.version = 11 : i64} {
  func.func @base_model_kernel(%arg0: i32, %arg1: memref<2x128xf32, #tpu.memory_space<vmem>>, %arg2: memref<32x1xf32, #tpu.memory_space<vmem>>, %arg3: memref<32x1xf32, #tpu.memory_space<vmem>>, %arg4: memref<32x1xf32, #tpu.memory_space<vmem>>, %arg5: memref<256x32xbf16, #tpu.memory_space<vmem>>, %arg6: memref<256x1xf32, #tpu.memory_space<vmem>>, %arg7: memref<128x256xbf16, #tpu.memory_space<vmem>>, %arg8: memref<128x1xf32, #tpu.memory_space<vmem>>, %arg9: memref<128x1xf32, #tpu.memory_space<vmem>>, %arg10: memref<1x1xf32, #tpu.memory_space<vmem>>, %arg11: memref<1x128xf32, #tpu.memory_space<vmem>>) attributes {dimension_semantics = [#tpu.dimension_semantics<parallel>], iteration_bounds = array<i64: 1>, scalar_prefetch = 0 : i64, scratch_operands = 0 : i64, tpu.core_type = #tpu.core_type<tc>, window_params = [{transform_indices = @transform_0, window_bounds = array<i64: 2, 128>}, {pipeline_mode = #tpu.pipeline_mode<synchronous>, transform_indices = @transform_1, window_bounds = array<i64: 32, 1>}, {pipeline_mode = #tpu.pipeline_mode<synchronous>, transform_indices = @transform_2, window_bounds = array<i64: 32, 1>}, {pipeline_mode = #tpu.pipeline_mode<synchronous>, transform_indices = @transform_3, window_bounds = array<i64: 32, 1>}, {pipeline_mode = #tpu.pipeline_mode<synchronous>, transform_indices = @transform_4, window_bounds = array<i64: 256, 32>}, {pipeline_mode = #tpu.pipeline_mode<synchronous>, transform_indices = @transform_5, window_bounds = array<i64: 256, 1>}, {pipeline_mode = #tpu.pipeline_mode<synchronous>, transform_indices = @transform_6, window_bounds = array<i64: 128, 256>}, {pipeline_mode = #tpu.pipeline_mode<synchronous>, transform_indices = @transform_7, window_bounds = array<i64: 128, 1>}, {pipeline_mode = #tpu.pipeline_mode<synchronous>, transform_indices = @transform_8, window_bounds = array<i64: 128, 1>}, {pipeline_mode = #tpu.pipeline_mode<synchronous>, transform_indices = @transform_9, window_bounds = array<i64: 1, 1>}, {transform_indices = @transform_10, window_bounds = array<i64: 1, 128>}]} {
    %c0 = arith.constant 0 : index
    %c0_0 = arith.constant 0 : index
    %0 = vector.load %arg1[%c0, %c0_0] : memref<2x128xf32, #tpu.memory_space<vmem>>, vector<2x128xf32>
    %1 = vector.extract_strided_slice %0 {offsets = [0, 0], sizes = [1, 128], strides = [1, 1]} : vector<2x128xf32> to vector<1x128xf32>
    %2 = vector.extract_strided_slice %0 {offsets = [1, 0], sizes = [1, 128], strides = [1, 1]} : vector<2x128xf32> to vector<1x128xf32>
    %c0_1 = arith.constant 0 : index
    %c0_2 = arith.constant 0 : index
    %3 = vector.load %arg2[%c0_1, %c0_2] : memref<32x1xf32, #tpu.memory_space<vmem>>, vector<32x1xf32>
    %4 = vector.broadcast %3 : vector<32x1xf32> to vector<32x128xf32>
    %5 = vector.broadcast %1 : vector<1x128xf32> to vector<32x128xf32>
    %6 = arith.mulf %4, %5 : vector<32x128xf32>
    %c0_3 = arith.constant 0 : index
    %c0_4 = arith.constant 0 : index
    %7 = vector.load %arg3[%c0_3, %c0_4] : memref<32x1xf32, #tpu.memory_space<vmem>>, vector<32x1xf32>
    %8 = vector.broadcast %7 : vector<32x1xf32> to vector<32x128xf32>
    %9 = vector.broadcast %2 : vector<1x128xf32> to vector<32x128xf32>
    %10 = arith.mulf %8, %9 : vector<32x128xf32>
    %11 = arith.addf %6, %10 : vector<32x128xf32>
    %c0_5 = arith.constant 0 : index
    %c0_6 = arith.constant 0 : index
    %12 = vector.load %arg4[%c0_5, %c0_6] : memref<32x1xf32, #tpu.memory_space<vmem>>, vector<32x1xf32>
    %13 = vector.broadcast %12 : vector<32x1xf32> to vector<32x128xf32>
    %14 = arith.addf %11, %13 : vector<32x128xf32>
    %15 = math.sin %14 : vector<32x128xf32>
    %c0_7 = arith.constant 0 : index
    %c0_8 = arith.constant 0 : index
    %16 = vector.load %arg5[%c0_7, %c0_8] : memref<256x32xbf16, #tpu.memory_space<vmem>>, vector<256x32xbf16>
    %17 = arith.truncf %15 : vector<32x128xf32> to vector<32x128xbf16>
    %cst = arith.constant dense<0.000000e+00> : vector<256x128xf32>
    %18 = tpu.matmul %16, %17, %cst {dimension_numbers = #tpu.dot_dimension_numbers<[1], [0], [0], [1], [0, 0, 1, 1], [], []>} : vector<256x32xbf16>, vector<32x128xbf16>, vector<256x128xf32> -> vector<256x128xf32>
    %c0_9 = arith.constant 0 : index
    %c0_10 = arith.constant 0 : index
    %19 = vector.load %arg6[%c0_9, %c0_10] : memref<256x1xf32, #tpu.memory_space<vmem>>, vector<256x1xf32>
    %20 = vector.broadcast %19 : vector<256x1xf32> to vector<256x128xf32>
    %21 = arith.addf %18, %20 : vector<256x128xf32>
    %cst_11 = arith.constant 0.000000e+00 : f32
    %22 = vector.broadcast %cst_11 : f32 to vector<256x128xf32>
    %23 = arith.maximumf %21, %22 : vector<256x128xf32>
    %c0_12 = arith.constant 0 : index
    %c0_13 = arith.constant 0 : index
    %24 = vector.load %arg7[%c0_12, %c0_13] : memref<128x256xbf16, #tpu.memory_space<vmem>>, vector<128x256xbf16>
    %25 = arith.truncf %23 : vector<256x128xf32> to vector<256x128xbf16>
    %cst_14 = arith.constant dense<0.000000e+00> : vector<128x128xf32>
    %26 = tpu.matmul %24, %25, %cst_14 {dimension_numbers = #tpu.dot_dimension_numbers<[1], [0], [0], [1], [0, 0, 1, 1], [], []>} : vector<128x256xbf16>, vector<256x128xbf16>, vector<128x128xf32> -> vector<128x128xf32>
    %c0_15 = arith.constant 0 : index
    %c0_16 = arith.constant 0 : index
    %27 = vector.load %arg8[%c0_15, %c0_16] : memref<128x1xf32, #tpu.memory_space<vmem>>, vector<128x1xf32>
    %28 = vector.broadcast %27 : vector<128x1xf32> to vector<128x128xf32>
    %29 = arith.addf %26, %28 : vector<128x128xf32>
    %cst_17 = arith.constant 0.000000e+00 : f32
    %30 = vector.broadcast %cst_17 : f32 to vector<128x128xf32>
    %31 = arith.maximumf %29, %30 : vector<128x128xf32>
    %c0_18 = arith.constant 0 : index
    %c0_19 = arith.constant 0 : index
    %32 = vector.load %arg9[%c0_18, %c0_19] : memref<128x1xf32, #tpu.memory_space<vmem>>, vector<128x1xf32>
    %33 = vector.broadcast %32 : vector<128x1xf32> to vector<128x128xf32>
    %34 = arith.mulf %31, %33 : vector<128x128xf32>
    %cst_20 = arith.constant dense<0.000000e+00> : vector<128xf32>
    %35 = vector.multi_reduction <add>, %34, %cst_20 [0] : vector<128x128xf32> to vector<128xf32>
    %36 = vector.shape_cast %35 : vector<128xf32> to vector<1x128xf32>
    %c0_21 = arith.constant 0 : index
    %c0_22 = arith.constant 0 : index
    %37 = vector.load %arg10[%c0_21, %c0_22] : memref<1x1xf32, #tpu.memory_space<vmem>>, vector<1x1xf32>
    %38 = vector.broadcast %37 : vector<1x1xf32> to vector<1x128xf32>
    %39 = arith.addf %36, %38 : vector<1x128xf32>
    %c0_23 = arith.constant 0 : index
    %c0_24 = arith.constant 0 : index
    %40 = vector.load %arg11[%c0_23, %c0_24] : memref<1x128xf32, #tpu.memory_space<vmem>>, vector<1x128xf32>
    tpu.vector_store %arg11[%c0_23, %c0_24], %39 {strides = array<i32>} : memref<1x128xf32, #tpu.memory_space<vmem>>, vector<1x128xf32>,
    return
  }
  func.func @transform_0(%arg0: i32) -> (i32, i32) {
    %c0_i32 = arith.constant 0 : i32
    %c0_i32_0 = arith.constant 0 : i32
    return %c0_i32, %arg0 : i32, i32
  }
  func.func @transform_1(%arg0: i32) -> (i32, i32) {
    %c0_i32 = arith.constant 0 : i32
    %c0_i32_0 = arith.constant 0 : i32
    %c0_i32_1 = arith.constant 0 : i32
    return %c0_i32, %c0_i32_0 : i32, i32
  }
  func.func @transform_2(%arg0: i32) -> (i32, i32) {
    %c0_i32 = arith.constant 0 : i32
    %c0_i32_0 = arith.constant 0 : i32
    %c0_i32_1 = arith.constant 0 : i32
    return %c0_i32, %c0_i32_0 : i32, i32
  }
  func.func @transform_3(%arg0: i32) -> (i32, i32) {
    %c0_i32 = arith.constant 0 : i32
    %c0_i32_0 = arith.constant 0 : i32
    %c0_i32_1 = arith.constant 0 : i32
    return %c0_i32, %c0_i32_0 : i32, i32
  }
  func.func @transform_4(%arg0: i32) -> (i32, i32) {
    %c0_i32 = arith.constant 0 : i32
    %c0_i32_0 = arith.constant 0 : i32
    %c0_i32_1 = arith.constant 0 : i32
    return %c0_i32, %c0_i32_0 : i32, i32
  }
  func.func @transform_5(%arg0: i32) -> (i32, i32) {
    %c0_i32 = arith.constant 0 : i32
    %c0_i32_0 = arith.constant 0 : i32
    %c0_i32_1 = arith.constant 0 : i32
    return %c0_i32, %c0_i32_0 : i32, i32
  }
  func.func @transform_6(%arg0: i32) -> (i32, i32) {
    %c0_i32 = arith.constant 0 : i32
    %c0_i32_0 = arith.constant 0 : i32
    %c0_i32_1 = arith.constant 0 : i32
    return %c0_i32, %c0_i32_0 : i32, i32
  }
  func.func @transform_7(%arg0: i32) -> (i32, i32) {
    %c0_i32 = arith.constant 0 : i32
    %c0_i32_0 = arith.constant 0 : i32
    %c0_i32_1 = arith.constant 0 : i32
    return %c0_i32, %c0_i32_0 : i32, i32
  }
  func.func @transform_8(%arg0: i32) -> (i32, i32) {
    %c0_i32 = arith.constant 0 : i32
    %c0_i32_0 = arith.constant 0 : i32
    %c0_i32_1 = arith.constant 0 : i32
    return %c0_i32, %c0_i32_0 : i32, i32
  }
  func.func @transform_9(%arg0: i32) -> (i32, i32) {
    %c0_i32 = arith.constant 0 : i32
    %c0_i32_0 = arith.constant 0 : i32
    %c0_i32_1 = arith.constant 0 : i32
    return %c0_i32, %c0_i32_0 : i32, i32
  }
  func.func @transform_10(%arg0: i32) -> (i32, i32) {
    %c0_i32 = arith.constant 0 : i32
    %c0_i32_0 = arith.constant 0 : i32
    return %arg0, %c0_i32 : i32, i32
  }
}

</mosaic_0001>

<bundles_post_ra>
// kernel: tpu_custom_call.1
= control target key start
LH: loop header
LB: loop body
LE: loop exit
PB: predicated region body
PF: predicated region fallthrough
CT: control target
= control target key end

     0   :  { %s2710_s0 = inlined_call_operand.vmem [shape: f32[2,128], index: 0, kind: input, shape index: {}]   ;;  %s2711_s1 = inlined_call_operand.vmem [shape: f32[32,1], index: 1, kind: input, shape index: {}]   ;;  %s2712_s2 = inlined_call_operand.vmem [shape: f32[32,1], index: 2, kind: input, shape index: {}]   ;;  %s2713_s3 = inlined_call_operand.vmem [shape: f32[32,1], index: 3, kind: input, shape index: {}]   ;;  %s2714_s4 = inlined_call_operand.vmem [shape: bf16[256,32], index: 4, kind: input, shape index: {}]   ;;  %s2715_s5 = inlined_call_operand.vmem [shape: f32[256,1], index: 5, kind: input, shape index: {}]   ;;  %s2716_s6 = inlined_call_operand.vmem [shape: bf16[128,256], index: 6, kind: input, shape index: {}]   ;;  %s2717_s7 = inlined_call_operand.vmem [shape: f32[128,1], index: 7, kind: input, shape index: {}]   ;;  %s2718_s8 = inlined_call_operand.vmem [shape: f32[128,1], index: 8, kind: input, shape index: {}]   ;;  %s2719_s9 = inlined_call_operand.<no memory space> [shape: f32[1,1], index: 9, kind: input, shape index: {}]   ;;  %s2720_s10 = inlined_call_operand.hbm [shape: f32[1,128], index: 10, kind: output, shape index: {}]  }
   0x1   :  { %v15_v0 = vstv %s2719_s9 }
   0x2   :  { %16 = vst [vmem:[#allocation2] sm:$0x1] %v15_v0 }
   0x3   :  { %v74_v1 = vld [vmem:[%s2712_s2 + $0x10] sm:$0xff]  ;;  %v1882_v3 = vmov 0   ;;  %v75_v4 = vld [vmem:[%s2712_s2 + $0x18] sm:$0xff]  ;;  %v41_v6 = vld [vmem:[%s2711_s1 + $0x8] sm:$0xff] }
   0x4   :  { %v42_v2 = vld [vmem:[%s2711_s1 + $0x10] sm:$0xff]  ;;  %1803 = vset.pattern.permute.xlu1 %v1882_v3  ;;  %1802 = vset.pattern.permute.xlu0 %v1882_v3  ;;  %v43_v5 = vld [vmem:[%s2711_s1 + $0x18] sm:$0xff]  ;;  %v40_v7 = vld [vmem:[%s2711_s1] sm:$0xff] }
   0x5   :  { %88 = vperm.xlu1 %1803, %v74_v1   ;;  %56 = vperm.xlu0 %1802, %v42_v2   ;;  %v73_v8 = vld [vmem:[%s2712_s2 + $0x8] sm:$0xff]  ;;  %v72_v9 = vld [vmem:[%s2712_s2] sm:$0xff]  ;;  %v111_v10 = vld [vmem:[%s2713_s3 + $0x18] sm:$0xff] }
   0x6   :  { %v110_v11 = vld [vmem:[%s2713_s3 + $0x10] sm:$0xff]  ;;  %v109_v12 = vld [vmem:[%s2713_s3 + $0x8] sm:$0xff]  ;;  %v108_v13 = vld [vmem:[%s2713_s3] sm:$0xff] }
   0x7   :  { %v617_v14 = vld [vmem:[%s2715_s5 + $0xf8] sm:$0xff]  ;;  %v616_v15 = vld [vmem:[%s2715_s5 + $0xf0] sm:$0xff]  ;;  %v615_v18 = vld [vmem:[%s2715_s5 + $0xe8] sm:$0xff] }
   0x8   :  { %v601_v16 = vld [vmem:[%s2715_s5 + $0x78] sm:$0xff]  ;;  %v600_v17 = vld [vmem:[%s2715_s5 + $0x70] sm:$0xff]  ;;  %v614_v19 = vld [vmem:[%s2715_s5 + $0xe0] sm:$0xff] }
   0x9   :  { %93 = vperm.xlu1 %1803, %v75_v4   ;;  %61 = vperm.xlu0 %1802, %v43_v5   ;;  %v599_v20 = vld [vmem:[%s2715_s5 + $0x68] sm:$0xff]  ;;  %v598_v21 = vld [vmem:[%s2715_s5 + $0x60] sm:$0xff]  ;;  %v613_v22 = vld [vmem:[%s2715_s5 + $0xd8] sm:$0xff] }
   0xa   :  { %v612_v23 = vld [vmem:[%s2715_s5 + $0xd0] sm:$0xff] }
   0xd   :  { %51 = vperm.xlu1 %1803, %v41_v6   ;;  %46 = vperm.xlu0 %1802, %v40_v7  }
  0x11   :  { %83 = vperm.xlu1 %1803, %v73_v8   ;;  %78 = vperm.xlu0 %1802, %v72_v9  }
  0x15   :  { %129 = vperm.xlu1 %1803, %v111_v10   ;;  %124 = vperm.xlu0 %1802, %v110_v11  }
  0x19   :  { %119 = vperm.xlu1 %1803, %v109_v12   ;;  %114 = vperm.xlu0 %1802, %v108_v13  }
  0x1d   :  { %775 = vperm.xlu1 %1803, %v617_v14   ;;  %770 = vperm.xlu0 %1802, %v616_v15  }
  0x21   :  { %695 = vperm.xlu1 %1803, %v601_v16   ;;  %690 = vperm.xlu0 %1802, %v600_v17  }
  0x25   :  { %765 = vperm.xlu1 %1803, %v615_v18   ;;  %760 = vperm.xlu0 %1802, %v614_v19  }
  0x29   :  { %685 = vperm.xlu1 %1803, %v599_v20   ;;  %680 = vperm.xlu0 %1802, %v598_v21  }
  0x2a   :  { %17 = vsyncpa [#allocation4], 0  ;;  %v597_v24 = vld [vmem:[%s2715_s5 + $0x58] sm:$0xff]  ;;  %v596_v25 = vld [vmem:[%s2715_s5 + $0x50] sm:$0xff]  ;;  %v64_v0 = vlaneseq  ;;  %vm858_vm12 = vcmask 261120  }
  0x2b   :  { %v611_v26 = vld [vmem:[%s2715_s5 + $0xc8] sm:$0xff]  ;;  %v610_v27 = vld [vmem:[%s2715_s5 + $0xc0] sm:$0xff]  ;;  %v609_v30 = vld [vmem:[%s2715_s5 + $0xb8] sm:$0xff] }
  0x2c   :  { %v595_v28 = vld [vmem:[%s2715_s5 + $0x48] sm:$0xff]  ;;  %v594_v29 = vld [vmem:[%s2715_s5 + $0x40] sm:$0xff]  ;;  %v608_v31 = vld [vmem:[%s2715_s5 + $0xb0] sm:$0xff]  ;;  %v2140_v3 = vshrl.u32 %v64_v0, 7 }
  0x2d   :  { %755 = vperm.xlu1 %1803, %v613_v22   ;;  %750 = vperm.xlu0 %1802, %v612_v23   ;;  %v593_v32 = vld [vmem:[%s2715_s5 + $0x38] sm:$0xff]  ;;  %v592_v33 = vld [vmem:[%s2715_s5 + $0x30] sm:$0xff]  ;;  %v607_v34 = vld [vmem:[%s2715_s5 + $0xa8] sm:$0xff] }
  0x2e   :  { %v606_v35 = vld [vmem:[%s2715_s5 + $0xa0] sm:$0xff]  ;;  %v591_v36 = vld [vmem:[%s2715_s5 + $0x28] sm:$0xff]  ;;  %v605_v38 = vld [vmem:[%s2715_s5 + $0x98] sm:$0xff]  ;;  %v98_v8 = vsub.s32 1, %v2140_v3  ;;  %v66_v9 = vsub.s32 0, %v2140_v3 }
  0x2f   :  { %v590_v37 = vld [vmem:[%s2715_s5 + $0x20] sm:$0xff]  ;;  %v604_v39 = vld [vmem:[%s2715_s5 + $0x90] sm:$0xff]  ;;  %v589_v40 = vld [vmem:[%s2715_s5 + $0x18] sm:$0xff] }
  0x30   :  { %v588_v41 = vld [vmem:[%s2715_s5 + $0x10] sm:$0xff]  ;;  %v603_v42 = vld [vmem:[%s2715_s5 + $0x88] sm:$0xff]  ;;  %v602_v43 = vld [vmem:[%s2715_s5 + $0x80] sm:$0xff] }
  0x31   :  { %675 = vperm.xlu1 %1803, %v597_v24   ;;  %670 = vperm.xlu0 %1802, %v596_v25   ;;  %v587_v44 = vld [vmem:[%s2715_s5 + $0x8] sm:$0xff]  ;;  %v586_v45 = vld [vmem:[%s2715_s5] sm:$0xff]  ;;  %v1135_v48 = vld [vmem:[%s2717_s7 + $0x18] sm:$0xff] }
  0x32   :  { %v1133_v46 = vld [vmem:[%s2717_s7 + $0x8] sm:$0xff]  ;;  %v1132_v47 = vld [vmem:[%s2717_s7] sm:$0xff]  ;;  %v1134_v49 = vld [vmem:[%s2717_s7 + $0x10] sm:$0xff] }
  0x33   :  { %v1137_v50 = vld [vmem:[%s2717_s7 + $0x28] sm:$0xff]  ;;  %v1136_v51 = vld [vmem:[%s2717_s7 + $0x20] sm:$0xff]  ;;  %v1424_v54 = vld [vmem:[%s2718_s8 + $0x18] sm:$0xff] }
  0x34   :  { %v1422_v52 = vld [vmem:[%s2718_s8 + $0x8] sm:$0xff]  ;;  %v1421_v53 = vld [vmem:[%s2718_s8] sm:$0xff]  ;;  %v1423_v55 = vld [vmem:[%s2718_s8 + $0x10] sm:$0xff] }
  0x35   :  { %745 = vperm.xlu1 %1803, %v611_v26   ;;  %740 = vperm.xlu0 %1802, %v610_v27   ;;  %v1425_v56 = vld [vmem:[%s2718_s8 + $0x20] sm:$0xff]  ;;  %v1138_v57 = vld [vmem:[%s2717_s7 + $0x30] sm:$0xff]  ;;  %v1426_v58 = vld [vmem:[%s2718_s8 + $0x28] sm:$0xff] }
  0x36   :  { %v1139_v59 = vld [vmem:[%s2717_s7 + $0x38] sm:$0xff]  ;;  %v1427_v60 = vld [vmem:[%s2718_s8 + $0x30] sm:$0xff]  ;;  %v1140_v61 = vld [vmem:[%s2717_s7 + $0x40] sm:$0xff] }
  0x37   :  { %v1428_v62 = vld [vmem:[%s2718_s8 + $0x38] sm:$0xff]  ;;  %v1141_v63 = vld [vmem:[%s2717_s7 + $0x48] sm:$0xff]  ;;  %v1429_v1 = vld [vmem:[%s2718_s8 + $0x40] sm:$0xff] }
  0x38   :  { %v1142_v2 = vld [vmem:[%s2717_s7 + $0x50] sm:$0xff]  ;;  %v1430_v6 = vld [vmem:[%s2718_s8 + $0x48] sm:$0xff]  ;;  %v1143_v7 = vld [vmem:[%s2717_s7 + $0x58] sm:$0xff] }
  0x39   :  { %665 = vperm.xlu1 %1803, %v595_v28   ;;  %660 = vperm.xlu0 %1802, %v594_v29   ;;  %v39_v10 = vld [vmem:[%s2710_s0] sm:$0x3]  ;;  %v1431_v13 = vld [vmem:[%s2718_s8 + $0x50] sm:$0xff]  ;;  %v1432_v19 = vld [vmem:[%s2718_s8 + $0x58] sm:$0xff] }
  0x3a   :  { %v1144_v14 = vld [vmem:[%s2717_s7 + $0x60] sm:$0xff]  ;;  %v99_v15 = vrot.slane %v39_v10, %v98_v8  ;;  %v67_v16 = vrot.slane %v39_v10, %v66_v9  ;;  %v1145_v20 = vld [vmem:[%s2717_s7 + $0x68] sm:$0xff]  ;;  %v1146_v28 = vld [vmem:[%s2717_s7 + $0x70] sm:$0xff] }
  0x3b   :  { %v1433_v27 = vld [vmem:[%s2718_s8 + $0x60] sm:$0xff] }
  0x3d   :  { %735 = vperm.xlu1 %1803, %v609_v30   ;;  %730 = vperm.xlu0 %1802, %v608_v31  }
  0x41   :  { %655 = vperm.xlu1 %1803, %v593_v32   ;;  %650 = vperm.xlu0 %1802, %v592_v33  }
  0x45   :  { %725 = vperm.xlu1 %1803, %v607_v34   ;;  %720 = vperm.xlu0 %1802, %v606_v35  }
  0x49   :  { %645 = vperm.xlu1 %1803, %v591_v36   ;;  %640 = vperm.xlu0 %1802, %v590_v37  }
  0x4d   :  { %715 = vperm.xlu1 %1803, %v605_v38   ;;  %710 = vperm.xlu0 %1802, %v604_v39   ;;  %v1434_v39 = vld [vmem:[%s2718_s8 + $0x68] sm:$0xff] }
  0x51   :  { %635 = vperm.xlu1 %1803, %v589_v40   ;;  %630 = vperm.xlu0 %1802, %v588_v41   ;;  %v1147_v40 = vld [vmem:[%s2717_s7 + $0x78] sm:$0xff] }
  0x55   :  { %705 = vperm.xlu1 %1803, %v603_v42   ;;  %700 = vperm.xlu0 %1802, %v602_v43  }
  0x59   :  { %625 = vperm.xlu1 %1803, %v587_v44   ;;  %620 = vperm.xlu0 %1802, %v586_v45  }
  0x5d   :  { %1155 = vperm.xlu1 %1803, %v1133_v46   ;;  %1150 = vperm.xlu0 %1802, %v1132_v47  }
  0x61   :  { %1165 = vperm.xlu1 %1803, %v1135_v48   ;;  %1160 = vperm.xlu0 %1802, %v1134_v49  }
  0x65   :  { %1175 = vperm.xlu1 %1803, %v1137_v50   ;;  %1170 = vperm.xlu0 %1802, %v1136_v51  }
  0x69   :  { %1444 = vperm.xlu1 %1803, %v1422_v52   ;;  %1439 = vperm.xlu0 %1802, %v1421_v53  }
  0x6d   :  { %1454 = vperm.xlu1 %1803, %v1424_v54   ;;  %1449 = vperm.xlu0 %1802, %v1423_v55   ;;  %v1436_v54 = vld [vmem:[%s2718_s8 + $0x78] sm:$0xff]  ;;  %v1435_v55 = vld [vmem:[%s2718_s8 + $0x70] sm:$0xff] }
  0x71   :  { %1459 = vperm.xlu1 %1803, %v1425_v56   ;;  %1180 = vperm.xlu0 %1802, %v1138_v57  }
  0x75   :  { %1464 = vperm.xlu1 %1803, %v1426_v58   ;;  %1185 = vperm.xlu0 %1802, %v1139_v59  }
  0x79   :  { %1469 = vperm.xlu1 %1803, %v1427_v60   ;;  %1190 = vperm.xlu0 %1802, %v1140_v61  }
  0x7d   :  { %1474 = vperm.xlu1 %1803, %v1428_v62   ;;  %1195 = vperm.xlu0 %1802, %v1141_v63  }
  0x80   :  { %v89_v4 = vpop.permute.xlu1 %88  ;;  %v57_v5 = vpop.permute.xlu0 %56 }
  0x81   :  { %1479 = vperm.xlu1 %1803, %v1429_v1   ;;  %1200 = vperm.xlu0 %1802, %v1142_v2   ;;  %v102_v21 = vmul.f32 %v99_v15, %v89_v4  ;;  %v70_v22 = vmul.f32 %v67_v16, %v57_v5  ;;  %v1554_v2 = vld [vmem:[#allocation2] sm:$0x1] }
  0x83   :  { %v106_v31 = vadd.f32 %v102_v21, %v70_v22 }
  0x84   :  { %v94_v11 = vpop.permute.xlu1 %93  ;;  %v62_v12 = vpop.permute.xlu0 %61 }
  0x85   :  { %1484 = vperm.xlu1 %1803, %v1430_v6   ;;  %1205 = vperm.xlu0 %1802, %v1143_v7   ;;  %v103_v23 = vmul.f32 %v99_v15, %v94_v11  ;;  %v71_v24 = vmul.f32 %v67_v16, %v62_v12 }
  0x87   :  { %v107_v30 = vadd.f32 %v103_v23, %v71_v24  ;;  %v1885_v23 = vmov 2131351028  }
  0x88   :  { %v52_v17 = vpop.permute.xlu1 %51  ;;  %v47_v18 = vpop.permute.xlu0 %46 }
  0x89   :  { %1489 = vperm.xlu1 %1803, %v1431_v13   ;;  %1210 = vperm.xlu0 %1802, %v1144_v14   ;;  %v69_v35 = vmul.f32 %v67_v16, %v52_v17  ;;  %v68_v38 = vmul.f32 %v67_v16, %v47_v18  ;;  %v1883_v18 = vmov 683565275  }
  0x8c   :  { %v84_v25 = vpop.permute.xlu1 %83  ;;  %v79_v26 = vpop.permute.xlu0 %78 }
  0x8d   :  { %1494 = vperm.xlu1 %1803, %v1432_v19   ;;  %1215 = vperm.xlu0 %1802, %v1145_v20   ;;  %v101_v29 = vmul.f32 %v99_v15, %v84_v25  ;;  %v100_v32 = vmul.f32 %v99_v15, %v79_v26  ;;  %v1884_v20 = vmov 2475754826   ;;  %v1886_v25 = vmov 2102212464  }
  0x8f   :  { %v105_v44 = vadd.f32 %v101_v29, %v69_v35  ;;  %v104_v48 = vadd.f32 %v100_v32, %v68_v38 }
  0x90   :  { %v130_v33 = vpop.permute.xlu1 %129  ;;  %v125_v34 = vpop.permute.xlu0 %124 }
  0x91   :  { %v2173_v36 = vadd.f32 %v130_v33, %v107_v30  ;;  %v2175_v37 = vadd.f32 %v125_v34, %v106_v31  ;;  %1499 = vperm.xlu1 %1803, %v1433_v27   ;;  %1220 = vperm.xlu0 %1802, %v1146_v28   ;;  %v1887_v27 = vmov 920167782   ;;  %v1888_v34 = vmov 1326507024  }
  0x93   :  { %v448_v41 = vand.u32 2147483647, %v2173_v36  ;;  %v451_v42 = vand.u32 2139095040, %v2173_v36  ;;  %v344_v43 = vand.u32 2147483647, %v2175_v37  ;;  %v347_v45 = vand.u32 2139095040, %v2175_v37 }
  0x94   :  { %v120_v46 = vpop.permute.xlu1 %119  ;;  %v115_v47 = vpop.permute.xlu0 %114 }
  0x95   :  { %v452_v49 = vshrl.u32 %v451_v42, 23  ;;  %v455_v50 = vand.u32 8388607, %v448_v41  ;;  %v351_v51 = vand.u32 8388607, %v344_v43  ;;  %v2191_v52 = vadd.f32 %v120_v46, %v105_v44  ;;  %1504 = vperm.xlu1 %1803, %v1434_v39   ;;  %1225 = vperm.xlu0 %1802, %v1147_v40  }
  0x96   :  { %v348_v53 = vshrl.u32 %v347_v45, 23  ;;  %v2199_v57 = vadd.f32 %v115_v47, %v104_v48 }
  0x97   :  { %v1592_v56 = vadd.s32 4294967169, %v452_v49  ;;  %v456_v58 = vor.u32 8388608, %v455_v50  ;;  %v243_v60 = vand.u32 2139095040, %v2191_v52  ;;  %v352_v62 = vor.u32 8388608, %v351_v51 }
  0x98   :  { %v1588_v59 = vadd.s32 4294967169, %v348_v53  ;;  %v240_v0 = vand.u32 2147483647, %v2191_v52  ;;  %v136_v4 = vand.u32 2147483647, %v2199_v57  ;;  %v139_v16 = vand.u32 2139095040, %v2199_v57 }
  0x99   :  { %v458_v61 = vadd.s32 1, %v1592_v56  ;;  %1514 = vperm.xlu1 %1803, %v1436_v54   ;;  %1509 = vperm.xlu0 %1802, %v1435_v55   ;;  %v244_v1 = vshrl.u32 %v243_v60, 23  ;;  %v2204_v6 = vshll.u32 %v456_v58, 8  ;;  %v2206_v12 = vshll.u32 %v352_v62, 8 }
  0x9a   :  { %v354_v63 = vadd.s32 1, %v1588_v59  ;;  %v2212_v15 = vand.u32 8388607, %v240_v0 }
  0x9b   :  { %vm459_vm0 = vcmp.gt.s32.totalorder %v458_v61, 0  ;;  %v1584_v7 = vadd.s32 4294967169, %v244_v1 }
  0x9c   :  { %v460_v5 = vsel %vm459_vm0, %v458_v61, 0  ;;  %vm355_vm1 = vcmp.gt.s32.totalorder %v354_v63, 0 }
  0x9d   :  { %v461_v8 = vshrl.u32 %v460_v5, 5  ;;  %v462_v10 = vand.u32 31, %v460_v5  ;;  %v356_v11 = vsel %vm355_vm1, %v354_v63, 0  ;;  %1557 = vperm.xlu0 %1802, %v1554_v2   ;;  %v2217_v22 = vadd.s32 1, %v1584_v7 }
  0x9e   :  { %v2208_v13 = vshrl.u32 %v356_v11, 5  ;;  %v358_v14 = vand.u32 31, %v356_v11 }
  0x9f   :  { %v463_v17 = vsub.s32 32, %v462_v10  ;;  %v465_v19 = vshll.u32 %v1883_v18, %v462_v10  ;;  %v468_v21 = vshll.u32 %v1884_v20, %v462_v10  ;;  %v471_v24 = vshll.u32 %v1885_v23, %v462_v10 }
  0xa0   :  { %v474_v26 = vshll.u32 %v1886_v25, %v462_v10  ;;  %v477_v28 = vshll.u32 %v1887_v27, %v462_v10  ;;  %vm480_vm2 = vcmp.lt.s32.totalorder %v461_v8, 1  ;;  %vm481_vm3 = vcmp.lt.s32.totalorder %v461_v8, 2 }
  0xa1   :  { %v466_v29 = vshrl.u32 %v1884_v20, %v463_v17  ;;  %v469_v30 = vshrl.u32 %v1885_v23, %v463_v17  ;;  %v472_v31 = vshrl.u32 %v1886_v25, %v463_v17  ;;  %v464_v32 = vshrl.u32 %v1883_v18, %v463_v17 }
  0xa2   :  { %v475_v33 = vshrl.u32 %v1887_v27, %v463_v17  ;;  %v478_v35 = vshrl.u32 %v1888_v34, %v463_v17  ;;  %vm482_vm4 = vcmp.lt.s32.totalorder %v461_v8, 3  ;;  %v359_v42 = vsub.s32 32, %v358_v14 }
  0xa3   :  { %v467_v38 = vor.u32 %v466_v29, %v465_v19  ;;  %v470_v39 = vor.u32 %v469_v30, %v468_v21  ;;  %v473_v40 = vor.u32 %v472_v31, %v471_v24  ;;  %vm483_vm5 = vcmp.lt.s32.totalorder %v461_v8, 4 }
  0xa4   :  { %v476_v44 = vor.u32 %v475_v33, %v474_v26  ;;  %v479_v45 = vor.u32 %v478_v35, %v477_v28  ;;  %v361_v46 = vshll.u32 %v1883_v18, %v358_v14  ;;  %v364_v55 = vshll.u32 %v1884_v20, %v358_v14 }
  0xa5   :  { %v484_v47 = vsel %vm480_vm2, %v464_v32, %v467_v38  ;;  %v485_v48 = vsel %vm483_vm5, %v473_v40, 2102212464  ;;  %v488_v49 = vsel %vm480_vm2, %v467_v38, %v470_v39  ;;  %v492_v50 = vsel %vm480_vm2, %v470_v39, %v473_v40 }
  0xa6   :  { %v486_v51 = vsel %vm482_vm4, %v470_v39, %v485_v48  ;;  %v489_v53 = vsel %vm483_vm5, %v476_v44, 920167782  ;;  %v493_v54 = vsel %vm483_vm5, %v479_v45, 1326507024  ;;  %v360_v59 = vshrl.u32 %v1883_v18, %v359_v42 }
  0xa7   :  { %v490_v56 = vsel %vm482_vm4, %v473_v40, %v489_v53  ;;  %v494_v58 = vsel %vm482_vm4, %v476_v44, %v493_v54  ;;  %v362_v60 = vshrl.u32 %v1884_v20, %v359_v42  ;;  %v487_v61 = vsel %vm481_vm3, %v484_v47, %v486_v51 }
  0xa8   :  { %v491_v62 = vsel %vm481_vm3, %v488_v49, %v490_v56  ;;  %v495_v63 = vsel %vm481_vm3, %v492_v50, %v494_v58  ;;  %v365_v1 = vshrl.u32 %v1885_v23, %v359_v42  ;;  %v367_v19 = vshll.u32 %v1885_v23, %v358_v14 }
  0xa9   :  { %v2243_v2 = vmul.u32.u64.low %v2204_v6, %v495_v63  ;;  %v2244_v5 = vmul.u32.u64.high %v2204_v6, %v495_v63, %v2243_v2  ;;  %v2247_v7 = vmul.u32.u64.low %v2204_v6, %v491_v62  ;;  %v2248_v10 = vmul.u32.u64.high %v2204_v6, %v491_v62, %v2247_v7 }
  0xaa   :  { %v363_v11 = vor.u32 %v362_v60, %v361_v46  ;;  %v366_v17 = vor.u32 %v365_v1, %v364_v55  ;;  %v368_v21 = vshrl.u32 %v1886_v25, %v359_v42  ;;  %v503_v24 = vmul.u32 %v2204_v6, %v487_v61  ;;  %v1804_v55 = vld [vmem:[%s2714_s4] sm:$0xff]  }
  0xab   :  { %v370_v8 = vshll.u32 %v1886_v25, %v358_v14  ;;  %v371_v26 = vshrl.u32 %v1887_v27, %v359_v42  ;;  %v374_v28 = vshrl.u32 %v1888_v34, %v359_v42  ;;  %v373_v30 = vshll.u32 %v1887_v27, %v358_v14  ;;  %1730 = vmatprep.mubr.msk.bf16.mxu0 %vm858_vm12, %v1804_v55 }
  0xac   :  { %v369_v29 = vor.u32 %v368_v21, %v367_v19  ;;  %vm376_vm6 = vcmp.lt.s32.totalorder %v2208_v13, 1  ;;  %vm377_vm7 = vcmp.lt.s32.totalorder %v2208_v13, 2  ;;  %vm505_vm8 = vc.u32 %v2244_v5, %v2247_v7 }
  0xad   :  { %v506_v31 = vadd.s32 1, %v2248_v10  ;;  %v372_v32 = vor.u32 %v371_v26, %v370_v8  ;;  %vm378_vm9 = vcmp.lt.s32.totalorder %v2208_v13, 3  ;;  %v375_v6 = vor.u32 %v374_v28, %v373_v30 }
  0xae   :  { %vm379_vm10 = vcmp.lt.s32.totalorder %v2208_v13, 4  ;;  %v380_v33 = vsel %vm376_vm6, %v360_v59, %v363_v11  ;;  %v384_v35 = vsel %vm376_vm6, %v363_v11, %v366_v17  ;;  %v388_v40 = vsel %vm376_vm6, %v366_v17, %v369_v29 }
  0xaf   :  { %v507_v38 = vsel %vm505_vm8, %v506_v31, %v2248_v10  ;;  %v381_v39 = vsel %vm379_vm10, %v369_v29, 2102212464  ;;  %v385_v14 = vsel %vm379_vm10, %v372_v32, 920167782  ;;  %v389_v46 = vsel %vm379_vm10, %v375_v6, 1326507024 }
  0xb0   :  { %v508_v42 = vadd.s32 %v507_v38, %v503_v24  ;;  %v382_v44 = vsel %vm378_vm9, %v366_v17, %v381_v39  ;;  %v386_v45 = vsel %vm378_vm9, %v369_v29, %v385_v14  ;;  %v390_v48 = vsel %vm378_vm9, %v372_v32, %v389_v46 }
  0xb1   :  { %v387_v47 = vsel %vm377_vm7, %v384_v35, %v386_v45  ;;  %v248_v49 = vor.u32 8388608, %v2212_v15  ;;  %vm251_vm11 = vcmp.gt.s32.totalorder %v2217_v22, 0  ;;  %v391_v51 = vsel %vm377_vm7, %v388_v40, %v390_v48 }
  0xb2   :  { %v509_v50 = vadd.s32 536870912, %v508_v42  ;;  %v2271_v53 = vmul.u32.u64.low %v2206_v12, %v387_v47  ;;  %v2272_v54 = vmul.u32.u64.high %v2206_v12, %v387_v47, %v2271_v53  ;;  %v383_v56 = vsel %vm377_vm7, %v380_v33, %v382_v44 }
  0xb3   :  { %v2281_v15 = vmul.u32.u64.low %v2206_v12, %v391_v51  ;;  %v2282_v58 = vmul.u32.u64.high %v2206_v12, %v391_v51, %v2281_v15  ;;  %v252_v59 = vsel %vm251_vm11, %v2217_v22, 0  ;;  %v2289_v62 = vand.u32 8388607, %v136_v4 }
  0xb4   :  { %v2285_v60 = vshrl.u32 %v509_v50, 30  ;;  %v254_v61 = vand.u32 31, %v252_v59  ;;  %v2292_v63 = vadd.s32 %v2247_v7, %v2244_v5  ;;  %v2294_v1 = vshll.u32 %v248_v49, 8 }
  0xb5   :  { %v140_v13 = vshrl.u32 %v139_v16, 23  ;;  %v399_v22 = vmul.u32 %v2206_v12, %v383_v56  ;;  %v402_v10 = vadd.s32 1, %v2272_v54  ;;  %vm401_vm13 = vc.u32 %v2282_v58, %v2271_v53 }
  0xb6   :  { %v511_v2 = vshll.u32 %v2285_v60, 30  ;;  %v255_v11 = vsub.s32 32, %v254_v61  ;;  %v253_v5 = vshrl.u32 %v252_v59, 5  ;;  %v257_v7 = vshll.u32 %v1883_v18, %v254_v61 }
  0xb7   :  { %v260_v17 = vshll.u32 %v1884_v20, %v254_v61  ;;  %v403_v16 = vsel %vm401_vm13, %v402_v10, %v2272_v54  ;;  %v263_v12 = vshll.u32 %v1885_v23, %v254_v61  ;;  %v266_v28 = vshll.u32 %v1886_v25, %v254_v61 }
  0xb8   :  { %v2306_v19 = vsub.s32 %v508_v42, %v511_v2  ;;  %v258_v21 = vshrl.u32 %v1884_v20, %v255_v11  ;;  %v404_v24 = vadd.s32 %v403_v16, %v399_v22  ;;  %v261_v8 = vshrl.u32 %v1885_v23, %v255_v11 }
  0xb9   :  { %v264_v26 = vshrl.u32 %v1886_v25, %v255_v11  ;;  %v267_v31 = vshrl.u32 %v1887_v27, %v255_v11  ;;  %v269_v32 = vshll.u32 %v1887_v27, %v254_v61  ;;  %v270_v38 = vshrl.u32 %v1888_v34, %v255_v11 }
  0xba   :  { %v514_v29 = vsub.s32 0, %v2306_v19  ;;  %v259_v30 = vor.u32 %v258_v21, %v257_v7  ;;  %v405_v6 = vadd.s32 536870912, %v404_v24  ;;  %v262_v33 = vor.u32 %v261_v8, %v260_v17 }
  0xbb   :  { %v265_v35 = vor.u32 %v264_v26, %v263_v12  ;;  %v256_v14 = vshrl.u32 %v1883_v18, %v255_v11  ;;  %v268_v40 = vor.u32 %v267_v31, %v266_v28  ;;  %v1580_v42 = vadd.s32 4294967169, %v140_v13 }
  0xbc   :  { %v1593_v39 = vmin.u32 %v514_v29, %v2306_v19  ;;  %v2320_v44 = vshrl.u32 %v405_v6, 30  ;;  %v271_v45 = vor.u32 %v270_v38, %v269_v32  ;;  %vm272_vm14 = vcmp.lt.s32.totalorder %v253_v5, 1 }
  0xbd   :  { %vm275_vm15 = vcmp.lt.s32.totalorder %v253_v5, 4  ;;  %vm273_vm0 = vcmp.lt.s32.totalorder %v253_v5, 2  ;;  %v280_v48 = vsel %vm272_vm14, %v259_v30, %v262_v33  ;;  %vm274_vm1 = vcmp.lt.s32.totalorder %v253_v5, 3 }
  0xbe   :  { %v516_v46 = vclz %v1593_v39  ;;  %v277_v47 = vsel %vm275_vm15, %v265_v35, 2102212464  ;;  %v407_v49 = vshll.u32 %v2320_v44, 30  ;;  %v281_v50 = vsel %vm275_vm15, %v268_v40, 920167782 }
  0xbf   :  { %v284_v51 = vsel %vm272_vm14, %v262_v33, %v265_v35  ;;  %v276_v55 = vsel %vm272_vm14, %v256_v14, %v259_v30  ;;  %v282_v56 = vsel %vm274_vm1, %v265_v35, %v281_v50  ;;  %v285_v15 = vsel %vm275_vm15, %v271_v45, 1326507024 }
  0xc0   :  { %v1594_v54 = vadd.s32 4294967294, %v516_v46  ;;  %v2323_v59 = vsub.s32 %v404_v24, %v407_v49  ;;  %v278_v61 = vsel %vm274_vm1, %v262_v33, %v277_v47  ;;  %v283_v13 = vsel %vm273_vm0, %v280_v48, %v282_v56 }
  0xc1   :  { %v286_v2 = vsel %vm274_vm1, %v268_v40, %v285_v15  ;;  %v2328_v10 = vmul.u32.u64.low %v2294_v1, %v283_v13  ;;  %v2329_v11 = vmul.u32.u64.high %v2294_v1, %v283_v13, %v2328_v10  ;;  %v279_v8 = vsel %vm273_vm0, %v276_v55, %v278_v61 }
  0xc2   :  { %vm1595_vm2 = vcmp.lt.s32.totalorder %v1594_v54, 0  ;;  %v287_v22 = vsel %vm273_vm0, %v284_v51, %v286_v2  ;;  %v410_v17 = vsub.s32 0, %v2323_v59  ;;  %v146_v26 = vadd.s32 1, %v1580_v42 }
  0xc3   :  { %v519_v7 = vsel %vm1595_vm2, 0, %v1594_v54  ;;  %v2334_v16 = vmul.u32.u64.low %v2294_v1, %v287_v22  ;;  %v2335_v21 = vmul.u32.u64.high %v2294_v1, %v287_v22, %v2334_v16  ;;  %v144_v30 = vor.u32 8388608, %v2289_v62 }
  0xc4   :  { %v520_v12 = vsub.s32 32, %v519_v7  ;;  %v524_v24 = vsub.s32 4294967266, %v519_v7  ;;  %v521_v28 = vshll.u32 %v2306_v19, %v519_v7  ;;  %v1589_v29 = vmin.u32 %v410_v17, %v2323_v59 }
  0xc5   :  { %v298_v6 = vadd.s32 1, %v2329_v11  ;;  %vm147_vm3 = vcmp.gt.s32.totalorder %v146_v26, 0  ;;  %v295_v35 = vmul.u32 %v2294_v1, %v279_v8  ;;  %vm297_vm4 = vc.u32 %v2335_v21, %v2328_v10 }
  0xc6   :  { %v522_v31 = vshrl.u32 %v2292_v63, %v520_v12  ;;  %v525_v32 = vadd.s32 127, %v524_v24  ;;  %v412_v33 = vclz %v1589_v29  ;;  %v148_v5 = vsel %vm147_vm3, %v146_v26, 0 }
  0xc7   :  { %v299_v19 = vsel %vm297_vm4, %v298_v6, %v2329_v11  ;;  %v150_v62 = vand.u32 31, %v148_v5  ;;  %v400_v63 = vadd.s32 %v2271_v53, %v2282_v58  ;;  %v2349_v45 = vshll.u32 %v144_v30, 8 }
  0xc8   :  { %v523_v38 = vor.u32 %v522_v31, %v521_v28  ;;  %v526_v39 = vshll.u32 %v525_v32, 23  ;;  %v1590_v14 = vadd.s32 4294967294, %v412_v33  ;;  %v300_v40 = vadd.s32 %v299_v19, %v295_v35 }
  0xc9   :  { %v430_v46 = vsub.s32 4, %v2320_v44  ;;  %v2352_v47 = vshrl.u32 %v148_v5, 5  ;;  %v151_v48 = vsub.s32 32, %v150_v62  ;;  %v153_v54 = vshll.u32 %v1883_v18, %v150_v62 }
  0xca   :  { %v527_v42 = vor.u32 4788187, %v526_v39  ;;  %vm1591_vm5 = vcmp.lt.s32.totalorder %v1590_v14, 0  ;;  %v301_v1 = vadd.s32 536870912, %v300_v40  ;;  %v530_v50 = vcvt.s32.f32 %v523_v38 }
  0xcb   :  { %v415_v51 = vsel %vm1591_vm5, 0, %v1590_v14  ;;  %v156_v53 = vshll.u32 %v1884_v20, %v150_v62  ;;  %v154_v13 = vshrl.u32 %v1884_v20, %v151_v48  ;;  %v157_v2 = vshrl.u32 %v1885_v23, %v151_v48 }
  0xcc   :  { %v528_v49 = vand.u32 2147483647, %v527_v42  ;;  %v416_v55 = vsub.s32 32, %v415_v51  ;;  %v420_v56 = vsub.s32 4294967266, %v415_v51  ;;  %v2355_v15 = vshrl.u32 %v301_v1, 30 }
  0xcd   :  { %v417_v61 = vshll.u32 %v2323_v59, %v415_v51  ;;  %vm450_vm6 = vcmp.lt.s32.totalorder %v2173_v36, 0  ;;  %v160_v17 = vshrl.u32 %v1886_v25, %v151_v48  ;;  %v155_v16 = vor.u32 %v154_v13, %v153_v54 }
  0xce   :  { %v531_v58 = vmul.f32 %v530_v50, %v528_v49  ;;  %v418_v22 = vshrl.u32 %v400_v63, %v416_v55  ;;  %v421_v11 = vadd.s32 127, %v420_v56  ;;  %v303_v7 = vshll.u32 %v2355_v15, 30 }
  0xcf   :  { %v158_v12 = vor.u32 %v157_v2, %v156_v53  ;;  %v159_v24 = vshll.u32 %v1885_v23, %v150_v62  ;;  %vm168_vm7 = vcmp.lt.s32.totalorder %v2352_v47, 1  ;;  %v162_v20 = vshll.u32 %v1886_v25, %v150_v62 }
  0xd0   :  { %v419_v8 = vor.u32 %v418_v22, %v417_v61  ;;  %v422_v59 = vshll.u32 %v421_v11, 23  ;;  %v2366_v26 = vsub.s32 %v300_v40, %v303_v7  ;;  %vm346_vm8 = vcmp.lt.s32.totalorder %v2175_v37, 0 }
  0xd1   :  { %v161_v28 = vor.u32 %v160_v17, %v159_v24  ;;  %v163_v29 = vshrl.u32 %v1887_v27, %v151_v48  ;;  %v165_v30 = vshll.u32 %v1887_v27, %v150_v62  ;;  %v166_v31 = vshrl.u32 %v1888_v34, %v151_v48 }
  0xd2   :  { %v532_v32 = vxor.u32 2147483648, %v531_v58  ;;  %v423_v6 = vor.u32 4788187, %v422_v59  ;;  %v306_v23 = vsub.s32 0, %v2366_v26  ;;  %v152_v33 = vshrl.u32 %v1883_v18, %v151_v48 }
  0xd3   :  { %v426_v35 = vcvt.s32.f32 %v419_v8  ;;  %v164_v5 = vor.u32 %v163_v29, %v162_v20  ;;  %v167_v38 = vor.u32 %v166_v31, %v165_v30  ;;  %vm170_vm9 = vcmp.lt.s32.totalorder %v2352_v47, 3 }
  0xd4   :  { %v424_v25 = vand.u32 2147483647, %v423_v6  ;;  %v1585_v39 = vmin.u32 %v306_v23, %v2366_v26  ;;  %vm171_vm10 = vcmp.lt.s32.totalorder %v2352_v47, 4  ;;  %v176_v27 = vsel %vm168_vm7, %v155_v16, %v158_v12 }
  0xd5   :  { %v173_v34 = vsel %vm171_vm10, %v161_v28, 2102212464  ;;  %v177_v19 = vsel %vm171_vm10, %v164_v5, 920167782  ;;  %v180_v14 = vsel %vm168_vm7, %v158_v12, %v161_v28  ;;  %v181_v40 = vsel %vm171_vm10, %v167_v38, 1326507024 }
  0xd6   :  { %v427_v18 = vmul.f32 %v426_v35, %v424_v25  ;;  %v308_v62 = vclz %v1585_v39  ;;  %vm169_vm11 = vcmp.lt.s32.totalorder %v2352_v47, 2  ;;  %v178_v42 = vsel %vm170_vm9, %v161_v28, %v177_v19 }
  0xd7   :  { %v533_v63 = vsel %vm450_vm6, %v532_v32, %v531_v58  ;;  %v172_v1 = vsel %vm168_vm7, %v152_v33, %v155_v16  ;;  %v179_v48 = vsel %vm169_vm11, %v176_v27, %v178_v42  ;;  %v182_v49 = vsel %vm170_vm9, %v164_v5, %v181_v40 }
  0xd8   :  { %v428_v50 = vxor.u32 2147483648, %v427_v18  ;;  %v1586_v51 = vadd.s32 4294967294, %v308_v62  ;;  %v174_v54 = vsel %vm170_vm9, %v158_v12, %v173_v34  ;;  %v183_v55 = vsel %vm169_vm11, %v180_v14, %v182_v49 }
  0xd9   :  { %v2398_v56 = vmul.u32.u64.low %v2349_v45, %v183_v55  ;;  %v2399_v53 = vmul.u32.u64.high %v2349_v45, %v183_v55, %v2398_v56  ;;  %v2402_v58 = vmul.u32.u64.low %v2349_v45, %v179_v48  ;;  %v2403_v61 = vmul.u32.u64.high %v2349_v45, %v179_v48, %v2402_v58 }
  0xda   :  { %v429_v13 = vsel %vm346_vm8, %v428_v50, %v427_v18  ;;  %vm1587_vm13 = vcmp.lt.s32.totalorder %v1586_v51, 0  ;;  %vm2410_vm14 = vcmp.le.f32.partialorder %v344_v43, 0.7853982  ;;  %vm2416_vm15 = vcmp.le.f32.partialorder %v448_v41, 0.7853982 }
  0xdb   :  { %v311_v11 = vsel %vm1587_vm13, 0, %v1586_v51  ;;  %v175_v7 = vsel %vm169_vm11, %v172_v1, %v174_v54  ;;  %v432_v17 = vsel %vm2410_vm14, %v2175_v37, %v429_v13  ;;  %v534_v16 = vsub.s32 4, %v2285_v60 }
  0xdc   :  { %v316_v43 = vsub.s32 4294967266, %v311_v11  ;;  %v431_v41 = vsel %vm346_vm8, %v430_v46, %v2320_v44  ;;  %1844 = vcosq.f32 %v432_v17  ;;  %v536_v12 = vsel %vm2416_vm15, %v2173_v36, %v533_v63 }
  0xdd   :  { %vm193_vm0 = vc.u32 %v2399_v53, %v2402_v58  ;;  %v194_v47 = vadd.s32 1, %v2403_v61  ;;  %1846 = vsinq.f32 %v432_v17  ;;  %v312_v24 = vsub.s32 32, %v311_v11 }
  0xde   :  { %v317_v8 = vadd.s32 127, %v316_v43  ;;  %v191_v59 = vmul.u32 %v2349_v45, %v175_v7  ;;  %v296_v20 = vadd.s32 %v2328_v10, %v2335_v21  ;;  %v433_v46 = vsel %vm2410_vm14, 0, %v431_v41 }
  0xdf   :  { %v195_v44 = vsel %vm193_vm0, %v194_v47, %v2403_v61  ;;  %1848 = vcosq.f32 %v536_v12  ;;  %v535_v30 = vsel %vm450_vm6, %v534_v16, %v2285_v60  ;;  %v437_v6 = vadd.s32 3, %v433_v46 }
  0xe0   :  { %v318_v28 = vshll.u32 %v317_v8, 23  ;;  %v196_v29 = vadd.s32 %v195_v44, %v191_v59  ;;  %1850 = vsinq.f32 %v536_v12  ;;  %v314_v31 = vshrl.u32 %v296_v20, %v312_v24 }
  0xe1   :  { %v537_v45 = vsel %vm2416_vm15, 0, %v535_v30  ;;  %v313_v10 = vshll.u32 %v2366_v26, %v311_v11  ;;  %v438_v38 = vand.u32 3, %v437_v6  ;;  %vm436_vm5 = vweird.f32 %v2175_v37 }
  0xe2   :  { %v197_v32 = vadd.s32 536870912, %v196_v29  ;;  %v319_v21 = vor.u32 4788187, %v318_v28  ;;  %v541_v5 = vadd.s32 3, %v537_v45  ;;  %vm540_vm8 = vweird.f32 %v2173_v36 }
  0xe3   :  { %v315_v33 = vor.u32 %v314_v31, %v313_v10  ;;  %vm443_vm1 = vcmp.eq.s32.totalorder %v438_v38, 2  ;;  %vm440_vm2 = vcmp.eq.s32.totalorder %v438_v38, 0  ;;  %vm439_vm3 = vcmp.lt.s32.totalorder %v438_v38, 2 }
  0xe4   :  { %v2449_v23 = vshrl.u32 %v197_v32, 30  ;;  %v320_v25 = vand.u32 2147483647, %v319_v21  ;;  %v542_v40 = vand.u32 3, %v541_v5  ;;  %vm242_vm10 = vcmp.lt.s32.totalorder %v2191_v52, 0 }
  0xe5   :  { %v322_v34 = vcvt.s32.f32 %v315_v33  ;;  %v192_v37 = vadd.s32 %v2402_v58, %v2399_v53  ;;  %vm2461_vm11 = vcmp.le.f32.partialorder %v240_v0, 0.7853982  ;;  %v326_v0 = vsub.s32 4, %v2355_v15 }
  0xe6   :  { %v199_v35 = vshll.u32 %v2449_v23, 30  ;;  %vm547_vm4 = vcmp.eq.s32.totalorder %v542_v40, 2  ;;  %vm543_vm6 = vcmp.lt.s32.totalorder %v542_v40, 2  ;;  %vm544_vm7 = vcmp.eq.s32.totalorder %v542_v40, 0 }
  0xe7   :  { %v323_v26 = vmul.f32 %v322_v34, %v320_v25  ;;  %vm138_vm13 = vcmp.lt.s32.totalorder %v2199_v57, 0  ;;  %v222_v30 = vsub.s32 4, %v2449_v23  ;;  %vm137_vm14 = vcmp.le.f32.partialorder %v136_v4, 0.7853982 }
  0xe8   :  { %v200_v39 = vsub.s32 %v196_v29, %v199_v35  ;;  %v327_v29 = vsel %vm242_vm10, %v326_v0, %v2355_v15 }
  0xe9   :  { %v1845_v60 = vpop.eup %1844  ;;  %v324_v56 = vxor.u32 2147483648, %v323_v26  ;;  %v329_v6 = vsel %vm2461_vm11, 0, %v327_v29  ;;  %v223_v45 = vsel %vm138_vm13, %v222_v30, %v2449_v23  ;;  %v1822_v29 = vld [vmem:[%s2716_s6 + $0x4] ss:$8 sps:$4 sm:$0xff]   ;;  %v1825_v30 = vld [vmem:[%s2716_s6 + $0x14] ss:$8 sps:$4 sm:$0xff]  }
  0xea   :  { %v1847_v27 = vpop.eup %1846  ;;  %v202_v19 = vsub.s32 0, %v200_v39  ;;  %v444_v14 = vxor.u32 2147483648, %v1845_v60  ;;  %v333_v10 = vadd.s32 3, %v329_v6  ;;  %v225_v33 = vsel %vm137_vm14, 0, %v223_v45  ;;  %1348 = vmatprep.mubr.bf16.mxu1 %v1825_v30 }
  0xeb   :  { %v441_v18 = vxor.u32 2147483648, %v1847_v27  ;;  %v325_v16 = vsel %vm242_vm10, %v324_v56, %v323_v26  ;;  %v229_v5 = vadd.s32 3, %v225_v33  ;;  %v1814_v56 = vld [vmem:[%s2714_s4 + $0x50] sm:$0xff]  }
  0xec   :  { %v1849_v62 = vpop.eup %1848  ;;  %v1581_v42 = vmin.u32 %v202_v19, %v200_v39  ;;  %v445_v63 = vsel %vm443_vm1, %v444_v14, %v1847_v27  ;;  %v328_v8 = vsel %vm2461_vm11, %v2191_v52, %v325_v16  ;;  %v334_v35 = vand.u32 3, %v333_v10 }
  0xed   :  { %v1851_v1 = vpop.eup %1850  ;;  %v442_v48 = vsel %vm440_vm2, %v1845_v60, %v441_v18  ;;  %v548_v49 = vxor.u32 2147483648, %v1849_v62  ;;  %1852 = vcosq.f32 %v328_v8  ;;  %v230_v4 = vand.u32 3, %v229_v5 }
  0xee   :  { %v204_v50 = vclz %v1581_v42  ;;  %v446_v51 = vsel %vm439_vm3, %v442_v48, %v445_v63  ;;  %v545_v54 = vxor.u32 2147483648, %v1851_v1  ;;  %1854 = vsinq.f32 %v328_v8  ;;  %v1806_v48 = vld [vmem:[%s2714_s4 + $0x10] sm:$0xff]  }
  0xef   :  { %v549_v55 = vsel %vm547_vm4, %v548_v49, %v1851_v1  ;;  %v447_v13 = vsel %vm436_vm5, nan, %v446_v51  ;;  %vm336_vm15 = vcmp.eq.s32.totalorder %v334_v35, 0  ;;  %vm339_vm0 = vcmp.eq.s32.totalorder %v334_v35, 2  ;;  %v1805_v1 = vld [vmem:[%s2714_s4 + $0x8] sm:$0xff]   ;;  %v1811_v51 = vld [vmem:[%s2714_s4 + $0x38] sm:$0xff]  }
  0xf0   :  { %v1582_v61 = vadd.s32 4294967294, %v204_v50  ;;  %v546_v2 = vsel %vm544_vm7, %v1849_v62, %v545_v54  ;;  %vm335_vm1 = vcmp.lt.s32.totalorder %v334_v35, 2  ;;  %vm235_vm2 = vcmp.eq.s32.totalorder %v230_v4, 2  ;;  %v1809_v49 = vld [vmem:[%s2714_s4 + $0x28] sm:$0xff]   ;;  %v1810_v50 = vld [vmem:[%s2714_s4 + $0x30] sm:$0xff]   ;;  %v1812_v54 = vld [vmem:[%s2714_s4 + $0x40] sm:$0xff]  }
  0xf1   :  { %v550_v22 = vsel %vm543_vm6, %v546_v2, %v549_v55  ;;  %vm232_vm3 = vcmp.eq.s32.totalorder %v230_v4, 0  ;;  %vm332_vm4 = vweird.f32 %v2191_v52  ;;  %vm231_vm5 = vcmp.lt.s32.totalorder %v230_v4, 2  ;;  %v1807_v52 = vld [vmem:[%s2714_s4 + $0x18] sm:$0xff]   ;;  %v1813_v55 = vld [vmem:[%s2714_s4 + $0x48] sm:$0xff]  }
  0xf2   :  { %vm1583_vm9 = vcmp.lt.s32.totalorder %v1582_v61, 0  ;;  %v551_v11 = vsel %vm540_vm8, nan, %v550_v22  ;;  %vm228_vm6 = vweird.f32 %v2199_v57  ;;  %v1817_v2 = vld [vmem:[%s2714_s4 + $0x68] sm:$0xff]   ;;  %v1818_v22 = vld [vmem:[%s2714_s4 + $0x70] sm:$0xff]  }
  0xf3   :  { %v207_v7 = vsel %vm1583_vm9, 0, %v1582_v61  ;;  %v585_v17 = vpack.c.bf16 %v551_v11, %v447_v13  ;;  %v1815_v61 = vld [vmem:[%s2714_s4 + $0x58] sm:$0xff]   ;;  %v1816_v13 = vld [vmem:[%s2714_s4 + $0x60] sm:$0xff]  }
  0xf4   :  { %v208_v43 = vsub.s32 32, %v207_v7  ;;  %v212_v41 = vsub.s32 4294967266, %v207_v7  ;;  %v209_v12 = vshll.u32 %v200_v39, %v207_v7  ;;  %v1819_v11 = vld [vmem:[%s2714_s4 + $0x78] sm:$0xff]   ;;  %v2542_v7 = vpop.permute.xlu0 %770 }
  0xf5   :  { %1726 = vmatprep.subr.bf16.mxu0 %v585_v17 }
  0xf6   :  { %v210_v47 = vshrl.u32 %v192_v37, %v208_v43  ;;  %v213_v24 = vadd.s32 127, %v212_v41  ;;  %1727 = vmatpush3.bf16.msra.mxu0 %v585_v17  ;;  %v2544_v17 = vpop.permute.xlu1 %775 }
  0xf8   :  { %v211_v59 = vor.u32 %v210_v47, %v209_v12  ;;  %v214_v20 = vshll.u32 %v213_v24, 23  ;;  %v2546_v16 = vpop.permute.xlu0 %690 }
  0xfa   :  { %v215_v53 = vor.u32 4788187, %v214_v20  ;;  %v218_v44 = vcvt.s32.f32 %v211_v59  ;;  %v1853_v21 = vpop.eup %1852  ;;  %v2548_v37 = vpop.permute.xlu1 %695 }
  0xfb   :  { %v1855_v15 = vpop.eup %1854  ;;  %v340_v25 = vxor.u32 2147483648, %v1853_v21 }
  0xfc   :  { %v216_v58 = vand.u32 2147483647, %v215_v53  ;;  %v337_v38 = vxor.u32 2147483648, %v1855_v15  ;;  %v2550_v43 = vpop.permute.xlu0 %760 }
  0xfd   :  { %v341_v60 = vsel %vm339_vm0, %v340_v25, %v1855_v15 }
  0xfe   :  { %v219_v46 = vmul.f32 %v218_v44, %v216_v58  ;;  %v338_v39 = vsel %vm336_vm15, %v1853_v21, %v337_v38  ;;  %v2552_v41 = vpop.permute.xlu1 %765 }
  0xff   :  { %v342_v14 = vsel %vm335_vm1, %v338_v39, %v341_v60 }
 0x100   :  { %v220_v28 = vxor.u32 2147483648, %v219_v46  ;;  %v343_v62 = vsel %vm332_vm4, nan, %v342_v14  ;;  %v2554_v36 = vpop.permute.xlu0 %680 }
 0x102   :  { %v221_v31 = vsel %vm138_vm13, %v220_v28, %v219_v46  ;;  %v2556_v12 = vpop.permute.xlu1 %685 }
 0x103   :  { %v224_v32 = vsel %vm137_vm14, %v2199_v57, %v221_v31  ;;  %v1808_v57 = vld [vmem:[%s2714_s4 + $0x20] sm:$0xff]  }
 0x104   :  { %1856 = vcosq.f32 %v224_v32  ;;  %v2558_v47 = vpop.permute.xlu0 %750 }
 0x105   :  { %1858 = vsinq.f32 %v224_v32 }
 0x106   :  { %v2560_v24 = vpop.permute.xlu1 %755 }
 0x108   :  { %v2562_v8 = vpop.permute.xlu0 %670 }
 0x10a   :  { %v2564_v59 = vpop.permute.xlu1 %675 }
 0x10c   :  { %v2566_v20 = vpop.permute.xlu0 %740 }
 0x10e   :  { %v2568_v53 = vpop.permute.xlu1 %745 }
 0x110   :  { %v2570_v58 = vpop.permute.xlu0 %660 }
 0x111   :  { %v1857_v27 = vpop.eup %1856 }
 0x112   :  { %v1859_v34 = vpop.eup %1858  ;;  %v236_v19 = vxor.u32 2147483648, %v1857_v27  ;;  %v2572_v44 = vpop.permute.xlu1 %665 }
 0x113   :  { %v233_v40 = vxor.u32 2147483648, %v1859_v34 }
 0x114   :  { %v237_v23 = vsel %vm235_vm2, %v236_v19, %v1859_v34  ;;  %v2574_v0 = vpop.permute.xlu0 %730 }
 0x115   :  { %v234_v18 = vsel %vm232_vm3, %v1857_v27, %v233_v40 }
 0x116   :  { %v238_v26 = vsel %vm231_vm5, %v234_v18, %v237_v23  ;;  %v2576_v46 = vpop.permute.xlu1 %735 }
 0x117   :  { %v239_v42 = vsel %vm228_vm6, nan, %v238_v26 }
 0x118   :  { %v584_v63 = vpack.c.bf16 %v343_v62, %v239_v42  ;;  %v651_v28 = vpop.permute.xlu0 %650 }
 0x11a   :  { %1728 = vmatprep.subr.bf16.mxu0 %v584_v63  ;;  %v656_v31 = vpop.permute.xlu1 %655 }
 0x11b   :  { %1729 = vmatpush3.bf16.msra.mxu0 %v584_v63 }
 0x11c   :  { %v2584_v32 = vpop.permute.xlu0 %720 }
 0x11e   :  { %1731 = vmatmul.mubr.msk.bf16.vlgmr.msra.gmra.mxu0 %vm858_vm12, %v1805_v1  ;;  %v2586_v6 = vpop.permute.xlu1 %725 }
 0x11f   :  { %1734 = vmatprep.mubr.msk.bf16.mxu0 %vm858_vm12, %v1806_v48 }
 0x120   :  { %v641_v45 = vpop.permute.xlu0 %640 }
 0x122   :  { %v646_v10 = vpop.permute.xlu1 %645 }
 0x124   :  { %v2588_v21 = vpop.permute.xlu0 %710 }
 0x126   :  { %1735 = vmatmul.mubr.msk.bf16.gmra.mxu0 %vm858_vm12, %v1807_v52  ;;  %v2590_v15 = vpop.permute.xlu1 %715 }
 0x127   :  { %1738 = vmatprep.mubr.msk.bf16.mxu0 %vm858_vm12, %v1808_v57 }
 0x128   :  { %v631_v33 = vpop.permute.xlu0 %630 }
 0x12a   :  { %v636_v35 = vpop.permute.xlu1 %635 }
 0x12c   :  { %v2592_v5 = vpop.permute.xlu0 %700 }
 0x12e   :  { %1739 = vmatmul.mubr.msk.bf16.gmra.mxu0 %vm858_vm12, %v1809_v49  ;;  %v2594_v38 = vpop.permute.xlu1 %705 }
 0x12f   :  { %1742 = vmatprep.mubr.msk.bf16.mxu0 %vm858_vm12, %v1810_v50 }
 0x130   :  { %v621_v60 = vpop.permute.xlu0 %620 }
 0x132   :  { %v626_v14 = vpop.permute.xlu1 %625 }
 0x136   :  { %1743 = vmatmul.mubr.msk.bf16.gmra.mxu0 %vm858_vm12, %v1811_v51 }
 0x137   :  { %1746 = vmatprep.mubr.msk.bf16.mxu0 %vm858_vm12, %v1812_v54 }
 0x13e   :  { %1747 = vmatmul.mubr.msk.bf16.gmra.mxu0 %vm858_vm12, %v1813_v55 }
 0x13f   :  { %1750 = vmatprep.mubr.msk.bf16.mxu0 %vm858_vm12, %v1814_v56 }
 0x146   :  { %1751 = vmatmul.mubr.msk.bf16.gmra.mxu0 %vm858_vm12, %v1815_v61 }
 0x147   :  { %1754 = vmatprep.mubr.msk.bf16.mxu0 %vm858_vm12, %v1816_v13 }
 0x14e   :  { %1755 = vmatmul.mubr.msk.bf16.gmra.mxu0 %vm858_vm12, %v1817_v2 }
 0x14f   :  { %1758 = vmatprep.mubr.msk.bf16.mxu0 %vm858_vm12, %v1818_v22 }
 0x156   :  { %1759 = vmatmul.mubr.msk.bf16.gmra.mxu0 %vm858_vm12, %v1819_v11 }
 0x157   :  { %1340 = vmatprep.mubr.bf16.mxu0 %v1822_v29 }
 0x1de   :  { %v1732_v25 = vpop.f32.mrf.mxu0 }
 0x1df   :  { %v950_v39 = vadd.f32 %v1732_v25, %v631_v33 }
 0x1e0   :  { %v941_v4 = vpop.f32.mrf.mxu0 }
 0x1e1   :  { %v942_v34 = vadd.f32 %v941_v4, %v621_v60  ;;  %v1070_v23 = vmax.f32 %v950_v39, 0.0 }
 0x1e2   :  { %v1733_v27 = vpop.f32.mrf.mxu0 }
 0x1e3   :  { %v953_v19 = vadd.f32 %v1733_v27, %v636_v35  ;;  %v1068_v42 = vmax.f32 %v942_v34, 0.0 }
 0x1e4   :  { %v944_v40 = vpop.f32.mrf.mxu0 }
 0x1e5   :  { %v1071_v18 = vmax.f32 %v953_v19, 0.0  ;;  %v945_v62 = vadd.f32 %v944_v40, %v626_v14 }
 0x1e6   :  { %v1736_v26 = vpop.f32.mrf.mxu0 }
 0x1e7   :  { %v2596_v63 = vpack.c.bf16 %v1071_v18, %v1070_v23  ;;  %v1069_v1 = vmax.f32 %v945_v62, 0.0  ;;  %v966_v57 = vadd.f32 %v1736_v26, %v651_v28 }
 0x1e8   :  { %v957_v48 = vpop.f32.mrf.mxu0 }
 0x1e9   :  { %v2598_v52 = vpack.c.bf16 %v1069_v1, %v1068_v42  ;;  %v958_v50 = vadd.f32 %v957_v48, %v641_v45  ;;  %v1074_v55 = vmax.f32 %v966_v57, 0.0 }
 0x1ea   :  { %v1737_v49 = vpop.f32.mrf.mxu0 }
 0x1eb   :  { %v969_v51 = vadd.f32 %v1737_v49, %v656_v31  ;;  %v1072_v2 = vmax.f32 %v958_v50, 0.0 }
 0x1ec   :  { %v960_v54 = vpop.f32.mrf.mxu0 }
 0x1ed   :  { %v1075_v56 = vmax.f32 %v969_v51, 0.0  ;;  %v961_v61 = vadd.f32 %v960_v54, %v646_v10 }
 0x1ee   :  { %v1740_v13 = vpop.f32.mrf.mxu0 }
 0x1ef   :  { %v2600_v22 = vpack.c.bf16 %v1075_v56, %v1074_v55  ;;  %v1073_v11 = vmax.f32 %v961_v61, 0.0 }
 0x1f0   :  { %v2602_v29 = vpop.f32.mrf.mxu0 }
 0x1f1   :  { %v2604_v30 = vpack.c.bf16 %v1073_v11, %v1072_v2 }
 0x1f2   :  { %v1741_v33 = vpop.f32.mrf.mxu0 }
 0x1f4   :  { %v976_v35 = vpop.f32.mrf.mxu0 }
 0x1f6   :  { %v1744_v25 = vpop.f32.mrf.mxu0 }
 0x1f7   :  { %v998_v57 = vadd.f32 %v1744_v25, %v2546_v16 }
 0x1f8   :  { %v989_v28 = vpop.f32.mrf.mxu0 }
 0x1fa   :  { %v1745_v4 = vpop.f32.mrf.mxu0 }
 0x1fb   :  { %v1001_v42 = vadd.f32 %v1745_v4, %v2548_v37  ;;  %v1082_v4 = vmax.f32 %v998_v57, 0.0 }
 0x1fc   :  { %v992_v45 = vpop.f32.mrf.mxu0 }
 0x1fd   :  { %v1083_v54 = vmax.f32 %v1001_v42, 0.0  ;;  %v993_v55 = vadd.f32 %v992_v45, %v2556_v12 }
 0x1fe   :  { %v2606_v31 = vpop.f32.mrf.mxu0 }
 0x1ff   :  { %v1123_v42 = vpack.c.bf16 %v1083_v54, %v1082_v4  ;;  %v1843_v4 = vld [vmem:[%s2716_s6 + $0x70] ss:$8 sps:$4 sm:$0xff]  }
 0x200   :  { %v2608_v39 = vpop.f32.mrf.mxu0 }
 0x202   :  { %v2610_v10 = vpop.f32.mrf.mxu0 }
 0x204   :  { %v2612_v60 = vpop.f32.mrf.mxu0 }
 0x206   :  { %v1752_v27 = vpop.f32.mrf.mxu0 }
 0x208   :  { %v2614_v34 = vpop.f32.mrf.mxu0 }
 0x20a   :  { %v1753_v19 = vpop.f32.mrf.mxu0 }
 0x20c   :  { %v1024_v14 = vpop.f32.mrf.mxu0 }
 0x20e   :  { %v1756_v40 = vpop.f32.mrf.mxu0 }
 0x20f   :  { %v1046_v16 = vadd.f32 %v1756_v40, %v2558_v47  ;;  %v1033_v40 = vadd.f32 %v1753_v19, %v2576_v46 }
 0x210   :  { %v1037_v23 = vpop.f32.mrf.mxu0 }
 0x211   :  { %v1038_v47 = vadd.f32 %v1037_v23, %v2566_v20 }
 0x212   :  { %v1757_v18 = vpop.f32.mrf.mxu0 }
 0x213   :  { %v1049_v61 = vadd.f32 %v1757_v18, %v2560_v24  ;;  %v1092_v57 = vmax.f32 %v1038_v47, 0.0 }
 0x214   :  { %v1040_v62 = vpop.f32.mrf.mxu0 }
 0x215   :  { %v1095_v12 = vmax.f32 %v1049_v61, 0.0  ;;  %v1041_v45 = vadd.f32 %v1040_v62, %v2568_v53  ;;  %v1837_v61 = vld [vmem:[%s2716_s6 + $0x50] ss:$8 sps:$4 sm:$0xff]  }
 0x216   :  { %v1760_v26 = vpop.f32.mrf.mxu0 }
 0x217   :  { %v1062_v48 = vadd.f32 %v1760_v26, %v2542_v7  ;;  %v990_v7 = vadd.f32 %v989_v28, %v2554_v36  ;;  %v1094_v36 = vmax.f32 %v1046_v16, 0.0  ;;  %v1093_v62 = vmax.f32 %v1041_v45, 0.0  ;;  %v1156_v16 = vpop.permute.xlu1 %1155 }
 0x218   :  { %v1053_v1 = vpop.f32.mrf.mxu0 }
 0x219   :  { %v1054_v50 = vadd.f32 %v1053_v1, %v2550_v43  ;;  %v1098_v2 = vmax.f32 %v1062_v48, 0.0  ;;  %v1081_v1 = vmax.f32 %v993_v55, 0.0  ;;  %v1080_v18 = vmax.f32 %v990_v7, 0.0  ;;  %v1834_v55 = vld [vmem:[%s2716_s6 + $0x40] ss:$8 sps:$4 sm:$0xff]   ;;  %v1151_v7 = vpop.permute.xlu0 %1150 }
 0x21a   :  { %v1761_v49 = vpop.f32.mrf.mxu0  ;;  %v1129_v53 = vpack.c.bf16 %v1095_v12, %v1094_v36 }
 0x21b   :  { %v1065_v51 = vadd.f32 %v1761_v49, %v2544_v17  ;;  %v1096_v25 = vmax.f32 %v1054_v50, 0.0  ;;  %v985_v17 = vadd.f32 %v1741_v33, %v2564_v59  ;;  %v977_v59 = vadd.f32 %v976_v35, %v2572_v44 }
 0x21c   :  { %v1056_v56 = vpop.f32.mrf.mxu0  ;;  %v1122_v33 = vpack.c.bf16 %v1081_v1, %v1080_v18  ;;  %v1091_v49 = vmax.f32 %v1033_v40, 0.0  ;;  %v1025_v44 = vadd.f32 %v1024_v14, %v2586_v6  ;;  %v1128_v35 = vpack.c.bf16 %v1093_v62, %v1092_v57 }
 0x21d   :  { %v1099_v11 = vmax.f32 %v1065_v51, 0.0  ;;  %v1057_v37 = vadd.f32 %v1056_v56, %v2552_v41  ;;  %v982_v41 = vadd.f32 %v1740_v13, %v2562_v8  ;;  %v1079_v28 = vmax.f32 %v985_v17, 0.0  ;;  %v1835_v56 = vld [vmem:[%s2716_s6 + $0x54] ss:$8 sps:$4 sm:$0xff]  }
 0x21e   :  { %v974_v8 = vadd.f32 %v2602_v29, %v2570_v58  ;;  %v1030_v13 = vadd.f32 %v1752_v27, %v2574_v0  ;;  %v1077_v23 = vmax.f32 %v977_v59, 0.0  ;;  %v1022_v58 = vadd.f32 %v2614_v34, %v2584_v32 }
 0x21f   :  { %v1131_v26 = vpack.c.bf16 %v1099_v11, %v1098_v2  ;;  %v1097_v43 = vmax.f32 %v1057_v37, 0.0  ;;  %v1078_v48 = vmax.f32 %v982_v41, 0.0  ;;  %v1017_v0 = vadd.f32 %v2610_v10, %v2590_v15  ;;  %v1838_v2 = vld [vmem:[%s2716_s6 + $0x64] ss:$8 sps:$4 sm:$0xff]   ;;  %v1840_v11 = vld [vmem:[%s2716_s6 + $0x60] ss:$8 sps:$4 sm:$0xff]  }
 0x220   :  { %v1076_v46 = vmax.f32 %v974_v8, 0.0  ;;  %v1090_v19 = vmax.f32 %v1030_v13, 0.0  ;;  %v1089_v50 = vmax.f32 %v1025_v44, 0.0  ;;  %v1014_v6 = vadd.f32 %v2606_v31, %v2588_v21  ;;  %v1841_v37 = vld [vmem:[%s2716_s6 + $0x74] ss:$8 sps:$4 sm:$0xff]  }
 0x221   :  { %v1130_v24 = vpack.c.bf16 %v1097_v43, %v1096_v25  ;;  %1662 = vmatprep.subr.bf16.mxu0 %v1131_v26  ;;  %1762 = vmatprep.subr.bf16.mxu1 %v1131_v26  ;;  %v1121_v20 = vpack.c.bf16 %v1079_v28, %v1078_v48  ;;  %v1088_v14 = vmax.f32 %v1022_v58, 0.0  ;;  %v1087_v51 = vmax.f32 %v1017_v0, 0.0  ;;  %v1161_v25 = vpop.permute.xlu0 %1160  ;;  %v1166_v26 = vpop.permute.xlu1 %1165 }
 0x222   :  { %1663 = vmatpush3.bf16.msra.mxu0 %v1123_v42  ;;  %1770 = vmatpush3.bf16.msra.mxu1 %v1123_v42  ;;  %v1120_v29 = vpack.c.bf16 %v1077_v23, %v1076_v46  ;;  %v1127_v27 = vpack.c.bf16 %v1091_v49, %v1090_v19  ;;  %v1009_v32 = vadd.f32 %v2612_v60, %v2594_v38  ;;  %v1086_v15 = vmax.f32 %v1014_v6, 0.0  ;;  %v1832_v60 = vld [vmem:[%s2716_s6 + $0x44] ss:$8 sps:$4 sm:$0xff]  }
 0x223   :  { %1664 = vmatprep.subr.bf16.mxu0 %v1130_v24  ;;  %1763 = vmatprep.subr.bf16.mxu1 %v1130_v24  ;;  %v1126_v34 = vpack.c.bf16 %v1089_v50, %v1088_v14  ;;  %v1006_v10 = vadd.f32 %v2608_v39, %v2592_v5  ;;  %v1820_v5 = vld [vmem:[%s2716_s6] ss:$8 sps:$4 sm:$0xff]   ;;  %v1829_v39 = vld [vmem:[%s2716_s6 + $0x34] ss:$8 sps:$4 sm:$0xff]  }
 0x224   :  { %v1125_v54 = vpack.c.bf16 %v1087_v51, %v1086_v15  ;;  %v1085_v21 = vmax.f32 %v1009_v32, 0.0 }
 0x225   :  { %v1084_v31 = vmax.f32 %v1006_v10, 0.0  ;;  %v1171_v43 = vpop.permute.xlu0 %1170  ;;  %v1176_v17 = vpop.permute.xlu1 %1175 }
 0x226   :  { %1665 = vmatpush3.bf16.msra.mxu0 %v1122_v33  ;;  %1771 = vmatpush3.bf16.msra.mxu1 %v1122_v33 }
 0x227   :  { %1666 = vmatprep.subr.bf16.mxu0 %v1129_v53  ;;  %1764 = vmatprep.subr.bf16.mxu1 %v1129_v53  ;;  %v1124_v38 = vpack.c.bf16 %v1085_v21, %v1084_v31 }
 0x229   :  { %v1440_v42 = vpop.permute.xlu0 %1439  ;;  %v1445_v1 = vpop.permute.xlu1 %1444 }
 0x22a   :  { %1667 = vmatpush3.bf16.msra.mxu0 %v1121_v20  ;;  %1772 = vmatpush3.bf16.msra.mxu1 %v1121_v20 }
 0x22b   :  { %1668 = vmatprep.subr.bf16.mxu0 %v1128_v35  ;;  %1765 = vmatprep.subr.bf16.mxu1 %v1128_v35 }
 0x22d   :  { %v1450_v12 = vpop.permute.xlu0 %1449  ;;  %v1455_v45 = vpop.permute.xlu1 %1454 }
 0x22e   :  { %1669 = vmatpush3.bf16.msra.mxu0 %v1120_v29  ;;  %1773 = vmatpush3.bf16.msra.mxu1 %v1120_v29 }
 0x22f   :  { %1670 = vmatprep.subr.bf16.mxu0 %v1127_v27  ;;  %1766 = vmatprep.subr.bf16.mxu1 %v1127_v27 }
 0x231   :  { %v1181_v24 = vpop.permute.xlu0 %1180  ;;  %v2696_v41 = vpop.permute.xlu1 %1459 }
 0x232   :  { %1671 = vmatpush3.bf16.msra.mxu0 %v2600_v22  ;;  %1774 = vmatpush3.bf16.msra.mxu1 %v2600_v22  ;;  %v1823_v22 = vld [vmem:[%s2716_s6 + $0x10] ss:$8 sps:$4 sm:$0xff]  }
 0x233   :  { %1672 = vmatprep.subr.bf16.mxu0 %v1126_v34  ;;  %1767 = vmatprep.subr.bf16.mxu1 %v1126_v34 }
 0x235   :  { %v1186_v47 = vpop.permute.xlu0 %1185  ;;  %v2698_v53 = vpop.permute.xlu1 %1464 }
 0x236   :  { %1673 = vmatpush3.bf16.msra.mxu0 %v2604_v30  ;;  %1775 = vmatpush3.bf16.msra.mxu1 %v2604_v30  ;;  %v1826_v30 = vld [vmem:[%s2716_s6 + $0x24] ss:$8 sps:$4 sm:$0xff]  }
 0x237   :  { %1674 = vmatprep.subr.bf16.mxu0 %v1125_v54  ;;  %1768 = vmatprep.subr.bf16.mxu1 %v1125_v54 }
 0x239   :  { %v1191_v8 = vpop.permute.xlu0 %1190  ;;  %v2700_v23 = vpop.permute.xlu1 %1469 }
 0x23a   :  { %1675 = vmatpush3.bf16.msra.mxu0 %v2596_v63  ;;  %1776 = vmatpush3.bf16.msra.mxu1 %v2596_v63  ;;  %v1828_v63 = vld [vmem:[%s2716_s6 + $0x20] ss:$8 sps:$4 sm:$0xff]  }
 0x23b   :  { %1676 = vmatprep.subr.bf16.mxu0 %v1124_v38  ;;  %1769 = vmatprep.subr.bf16.mxu1 %v1124_v38 }
 0x23d   :  { %v1196_v35 = vpop.permute.xlu0 %1195  ;;  %v1475_v27 = vpop.permute.xlu1 %1474 }
 0x23e   :  { %1677 = vmatpush3.bf16.msra.mxu0 %v2598_v52  ;;  %1777 = vmatpush3.bf16.msra.mxu1 %v2598_v52  ;;  %v1831_v52 = vld [vmem:[%s2716_s6 + $0x30] ss:$8 sps:$4 sm:$0xff]   ;;  %s1889_s6 = smov [#allocation3]  }
 0x23f   :  { %s1572_s24 = sshll.u32 %s1889_s6, 4  ;;  %s1573_s24 = int_to_ptr.vmem [resolvable:$true] %s1572_s24 }
 0x240   :  { %s1860_s25 = scalar_lea.vmem %s1573_s24, 16  ;;  %s1864_s26 = scalar_lea.vmem %s1573_s24, 32 }
 0x241   :  { %1341 = vmatmul.mubr.bf16.vlgmr.msra.gmra.mxu0 %v1820_v5  ;;  %1349 = vmatmul.mubr.bf16.vlgmr.msra.gmra.mxu1 %v1823_v22  ;;  %v1201_v14 = vpop.permute.xlu0 %1200  ;;  %v1480_v21 = vpop.permute.xlu1 %1479  ;;  %p1861_p0 = scmp.ne.s32.totalorder %s1573_s24, %s1860_s25  ;;  %p1865_p1 = scmp.lt.s32.totalorder %s1573_s24, %s1573_s24 }
 0x242   :  { %1356 = vmatprep.mubr.bf16.mxu1 %v1826_v30  ;;  %p1866_p2 = scmp.lt.s32.totalorder %s1864_s26, %s1860_s25 }
 0x244   :  { %p1867_p3 = por %p1866_p2, %p1865_p1 }
 0x246   :  { %p1868_p4 = pnand %p1867_p3, %p1861_p0 }
 0x249   :  { %1357 = vmatmul.mubr.bf16.gmra.mxu1 %v1828_v63  ;;  %v1206_v63 = vpop.permute.xlu0 %1205 }
 0x24a   :  { %1364 = vmatprep.mubr.bf16.mxu1 %v1829_v39 }
 0x251   :  { %1365 = vmatmul.mubr.bf16.gmra.mxu1 %v1831_v52 }
 0x252   :  { %1372 = vmatprep.mubr.bf16.mxu1 %v1832_v60 }
 0x259   :  { %1373 = vmatmul.mubr.bf16.gmra.mxu1 %v1834_v55 }
 0x25a   :  { %1380 = vmatprep.mubr.bf16.mxu1 %v1835_v56 }
 0x261   :  { %1381 = vmatmul.mubr.bf16.gmra.mxu1 %v1837_v61 }
 0x262   :  { %1388 = vmatprep.mubr.bf16.mxu1 %v1838_v2 }
 0x269   :  { %1389 = vmatmul.mubr.bf16.gmra.mxu1 %v1840_v11 }
 0x26a   :  { %1396 = vmatprep.mubr.bf16.mxu1 %v1841_v37  ;;  %v1485_v37 = vpop.permute.xlu1 %1484 }
 0x271   :  { %1397 = vmatmul.mubr.bf16.gmra.mxu1 %v1843_v4 }
 0x301   :  { %v1678_v18 = vpop.f32.mrf.mxu0  ;;  %v1684_v36 = vpop.f32.mrf.mxu1 }
 0x303   :  { %v1679_v28 = vpop.f32.mrf.mxu0  ;;  %v1685_v59 = vpop.f32.mrf.mxu1 }
 0x304   :  { %v1680_v49 = vadd.f32 %v1679_v28, %v1678_v18  ;;  %v1686_v29 = vadd.f32 %v1685_v59, %v1684_v36 }
 0x305   :  { %v1681_v33 = vpop.f32.mrf.mxu0  ;;  %v1687_v40 = vpop.f32.mrf.mxu1 }
 0x306   :  { %v1343_v58 = vadd.f32 %v1680_v49, %v1151_v7  ;;  %v1351_v32 = vadd.f32 %v1686_v29, %v1161_v25 }
 0x307   :  { %v1688_v62 = vpop.f32.mrf.mxu1  ;;  %v1682_v48 = vpop.f32.mrf.mxu0 }
 0x308   :  { %v1683_v57 = vadd.f32 %v1682_v48, %v1681_v33  ;;  %v1405_v51 = vmax.f32 %v1343_v58, 0.0  ;;  %v1689_v34 = vadd.f32 %v1688_v62, %v1687_v40  ;;  %v1407_v38 = vmax.f32 %v1351_v32, 0.0  ;;  %v1490_v48 = vpop.permute.xlu1 %1489 }
 0x309   :  { %v1690_v13 = vpop.f32.mrf.mxu1 }
 0x30a   :  { %v1346_v46 = vadd.f32 %v1683_v57, %v1156_v16  ;;  %v1517_v31 = vmul.f32 %v1440_v42, %v1405_v51  ;;  %v1354_v5 = vadd.f32 %v1689_v34, %v1166_v26  ;;  %v1519_v55 = vmul.f32 %v1450_v12, %v1407_v38 }
 0x30b   :  { %v1691_v20 = vpop.f32.mrf.mxu1 }
 0x30c   :  { %v1406_v50 = vmax.f32 %v1346_v46, 0.0  ;;  %v1692_v22 = vadd.f32 %v1691_v20, %v1690_v13  ;;  %v1408_v56 = vmax.f32 %v1354_v5, 0.0 }
 0x30d   :  { %v1693_v44 = vpop.f32.mrf.mxu1 }
 0x30e   :  { %v1518_v10 = vmul.f32 %v1445_v1, %v1406_v50  ;;  %v1359_v61 = vadd.f32 %v1692_v22, %v1171_v43  ;;  %v1211_v1 = vpop.permute.xlu0 %1210  ;;  %v1520_v42 = vmul.f32 %v1455_v45, %v1408_v56 }
 0x30f   :  { %v1694_v19 = vpop.f32.mrf.mxu1 }
 0x310   :  { %v1533_v39 = vadd.f32 %v1518_v10, %v1517_v31  ;;  %v1695_v52 = vadd.f32 %v1694_v19, %v1693_v44  ;;  %v1409_v18 = vmax.f32 %v1359_v61, 0.0 }
 0x311   :  { %v1696_v0 = vpop.f32.mrf.mxu1 }
 0x312   :  { %v1534_v4 = vadd.f32 %v1533_v39, %v1519_v55  ;;  %v1362_v7 = vadd.f32 %v1695_v52, %v1176_v17  ;;  %v1521_v43 = vmul.f32 %v2696_v41, %v1409_v18  ;;  %v1216_v49 = vpop.permute.xlu0 %1215 }
 0x313   :  { %v1697_v6 = vpop.f32.mrf.mxu1 }
 0x314   :  { %v1698_v11 = vadd.f32 %v1697_v6, %v1696_v0  ;;  %v1535_v59 = vadd.f32 %v1534_v4, %v1520_v42  ;;  %v1410_v33 = vmax.f32 %v1362_v7, 0.0  ;;  %v1495_v6 = vpop.permute.xlu1 %1494 }
 0x315   :  { %v1699_v15 = vpop.f32.mrf.mxu1 }
 0x316   :  { %v1367_v36 = vadd.f32 %v1698_v11, %v1181_v24  ;;  %v1536_v44 = vadd.f32 %v1535_v59, %v1521_v43  ;;  %v1522_v45 = vmul.f32 %v2698_v53, %v1410_v33  ;;  %v1221_v10 = vpop.permute.xlu0 %1220 }
 0x317   :  { %v1700_v54 = vpop.f32.mrf.mxu1 }
 0x318   :  { %v1701_v25 = vadd.f32 %v1700_v54, %v1699_v15  ;;  %v1411_v57 = vmax.f32 %v1367_v36, 0.0  ;;  %v1537_v51 = vadd.f32 %v1536_v44, %v1522_v45  ;;  %v1500_v52 = vpop.permute.xlu1 %1499 }
 0x319   :  { %v1702_v30 = vpop.f32.mrf.mxu1 }
 0x31a   :  { %v1370_v62 = vadd.f32 %v1701_v25, %v1186_v47  ;;  %v1523_v0 = vmul.f32 %v2700_v23, %v1411_v57  ;;  %v1226_v61 = vpop.permute.xlu0 %1225 }
 0x31b   :  { %v1703_v60 = vpop.f32.mrf.mxu1 }
 0x31c   :  { %v1704_v28 = vadd.f32 %v1703_v60, %v1702_v30  ;;  %v1412_v19 = vmax.f32 %v1370_v62, 0.0  ;;  %v1538_v31 = vadd.f32 %v1537_v51, %v1523_v0  ;;  %v1505_v42 = vpop.permute.xlu1 %1504 }
 0x31d   :  { %v1705_v2 = vpop.f32.mrf.mxu1 }
 0x31e   :  { %v1375_v20 = vadd.f32 %v1704_v28, %v1191_v8  ;;  %v1524_v32 = vmul.f32 %v1475_v27, %v1412_v19  ;;  %v1510_v59 = vpop.permute.xlu0 %1509 }
 0x31f   :  { %v1706_v16 = vpop.f32.mrf.mxu1 }
 0x320   :  { %v1707_v12 = vadd.f32 %v1706_v16, %v1705_v2  ;;  %v1413_v47 = vmax.f32 %v1375_v20, 0.0  ;;  %v1539_v22 = vadd.f32 %v1538_v31, %v1524_v32  ;;  %v1515_v43 = vpop.permute.xlu1 %1514 }
 0x321   :  { %v1708_v26 = vpop.f32.mrf.mxu1 }
 0x322   :  { %v1378_v24 = vadd.f32 %v1707_v12, %v1196_v35  ;;  %v1525_v53 = vmul.f32 %v1480_v21, %v1413_v47 }
 0x323   :  { %v1709_v40 = vpop.f32.mrf.mxu1 }
 0x324   :  { %v1710_v17 = vadd.f32 %v1709_v40, %v1708_v26  ;;  %v1414_v34 = vmax.f32 %v1378_v24, 0.0  ;;  %v1540_v60 = vadd.f32 %v1539_v22, %v1525_v53 }
 0x325   :  { %v1711_v13 = vpop.f32.mrf.mxu1 }
 0x326   :  { %v1383_v50 = vadd.f32 %v1710_v17, %v1201_v14  ;;  %v1526_v30 = vmul.f32 %v1485_v37, %v1414_v34 }
 0x327   :  { %v1712_v46 = vpop.f32.mrf.mxu1 }
 0x328   :  { %v1713_v58 = vadd.f32 %v1712_v46, %v1711_v13  ;;  %v1415_v38 = vmax.f32 %v1383_v50, 0.0  ;;  %v1541_v2 = vadd.f32 %v1540_v60, %v1526_v30  ;;  %v1558_v46 = vpop.permute.xlu0 %1557 }
 0x329   :  { %v1714_v29 = vpop.f32.mrf.mxu1  ;;  %v1563_v24 = vrot.slane %v1558_v46, %v66_v9 }
 0x32a   :  { %v1386_v8 = vadd.f32 %v1713_v58, %v1206_v63  ;;  %v1527_v55 = vmul.f32 %v1490_v48, %v1415_v38 }
 0x32b   :  { %v1715_v41 = vpop.f32.mrf.mxu1 }
 0x32c   :  { %v1716_v15 = vadd.f32 %v1715_v41, %v1714_v29  ;;  %v1416_v39 = vmax.f32 %v1386_v8, 0.0  ;;  %v1542_v16 = vadd.f32 %v1541_v2, %v1527_v55 }
 0x32d   :  { %v1717_v54 = vpop.f32.mrf.mxu1 }
 0x32e   :  { %v1391_v5 = vadd.f32 %v1716_v15, %v1211_v1  ;;  %v1528_v11 = vmul.f32 %v1495_v6, %v1416_v39 }
 0x32f   :  { %v1718_v35 = vpop.f32.mrf.mxu1 }
 0x330   :  { %v1719_v23 = vadd.f32 %v1718_v35, %v1717_v54  ;;  %v1417_v56 = vmax.f32 %v1391_v5, 0.0  ;;  %v1543_v18 = vadd.f32 %v1542_v16, %v1528_v11 }
 0x331   :  { %v1720_v14 = vpop.f32.mrf.mxu1 }
 0x332   :  { %v1394_v27 = vadd.f32 %v1719_v23, %v1216_v49  ;;  %v1529_v25 = vmul.f32 %v1500_v52, %v1417_v56 }
 0x333   :  { %v1721_v63 = vpop.f32.mrf.mxu1 }
 0x334   :  { %v1418_v4 = vmax.f32 %v1394_v27, 0.0  ;;  %v1722_v7 = vadd.f32 %v1721_v63, %v1720_v14  ;;  %v1544_v33 = vadd.f32 %v1543_v18, %v1529_v25 }
 0x335   :  { %v1723_v21 = vpop.f32.mrf.mxu1 }
 0x336   :  { %v1399_v1 = vadd.f32 %v1722_v7, %v1221_v10  ;;  %v1530_v26 = vmul.f32 %v1505_v42, %v1418_v4 }
 0x337   :  { %v1724_v37 = vpop.f32.mrf.mxu1 }
 0x338   :  { %v1419_v36 = vmax.f32 %v1399_v1, 0.0  ;;  %v1725_v28 = vadd.f32 %v1724_v37, %v1723_v21  ;;  %v1545_v12 = vadd.f32 %v1544_v33, %v1530_v26 }
 0x33a   :  { %v1531_v40 = vmul.f32 %v1510_v59, %v1419_v36  ;;  %v1402_v62 = vadd.f32 %v1725_v28, %v1226_v61 }
 0x33c   :  { %v1420_v48 = vmax.f32 %v1402_v62, 0.0  ;;  %v1546_v13 = vadd.f32 %v1545_v12, %v1531_v40 }
 0x33e   :  { %v1532_v57 = vmul.f32 %v1515_v43, %v1420_v48 }
 0x340   :  { %v1547_v20 = vadd.f32 %v1546_v13, %v1532_v57 }
 0x342   :  { %v1548_v17 = vrot.slane %v1547_v20, 4 }
 0x344   :  { %v1549_v49 = vadd.f32 %v1548_v17, %v1547_v20 }
 0x346   :  { %v1550_v44 = vrot.slane %v1549_v49, 2 }
 0x348   :  { %v1551_v45 = vadd.f32 %v1550_v44, %v1549_v49 }
 0x34a   :  { %v1552_v19 = vrot.slane %v1551_v45, 1 }
 0x34c   :  { %v1553_v58 = vadd.f32 %v1552_v19, %v1551_v45 }
 0x34e   :  { %v1564_v29 = vadd.f32 %v1563_v24, %v1553_v58 }
 0x350   :  { %1565 = vst [vmem:[#allocation3] sm:$0x1] %v1564_v29 }
 0x351   :  { %1871 = shalt.err (!%p1868_p4)
}
 0x352   :  { %1575 = dma.vmem_to_hbm [thread:$0]  %s1573_s24, 16, %s2720_s10, [#allocation4]  }
 0x353   :  { %1880 = dma.done.wait [#allocation4], 16  }
 0x354   :  { %1881 = vsyncadd [#allocation4], 4294967280 }
 0x355   :  { %1579 = vsyncpa [#allocation4], 1 }

</bundles_post_ra>
